<compile_context>
chip_gen: v6e
topology: v6e:2x2x1
jax: 0.10.0
libtpu: 0.0.40
codegen_flags: <defaults>
</compile_context>

<pallas_src>
import functools

import jax
import jax.numpy as jnp
from jax.experimental import pallas as pl
from jax.experimental.pallas import tpu as pltpu


# ----------------------------------------------------------------------------
# Pallas kernel (single grid point; everything resident in VMEM).
# ----------------------------------------------------------------------------
def _forecast_kernel(B, N, T, H, R,
                     x_ref, y_ref, wih0_ref, bih0_ref, w_rec_ref, b_rec_ref,
                     wih1_ref, bih1_ref, w_heads_ref, b_heads_ref,
                     wrev_ref, brev_ref, w_fin_ref, b_fin_ref, out_ref):
    f32 = jnp.float32
    M = B * N
    G3 = 3 * H

    # ---- GRU recurrence (row-major: state [M, H], gates [M, 3H]) ------------
    # Hoisted input->gate precompute for layer 0 (input_size == 1), all T at once.
    gi0_all = x_ref[...] * wih0_ref[...] + bih0_ref[...]           # [T*M, 3H]
    w_rec = w_rec_ref[...]                                         # [2H, 6H] block-diag
    b_rec = b_rec_ref[...]                                         # [1, 6H]
    wih1_t = wih1_ref[...]                                         # [H, 3H]
    bih1 = bih1_ref[...]                                           # [1, 3H]

    def gru_gates(gi, gh, h_prev):
        # PyTorch gate order r, z, n; b_ih folded into gi, b_hh folded into gh.
        r = jax.nn.sigmoid(gi[:, 0:H] + gh[:, 0:H])
        z = jax.nn.sigmoid(gi[:, H:2 * H] + gh[:, H:2 * H])
        n = jnp.tanh(gi[:, 2 * H:3 * H] + r * gh[:, 2 * H:3 * H])
        return (1.0 - z) * n + z * h_prev

    h1 = jnp.zeros((M, H), f32)
    h2 = jnp.zeros((M, H), f32)
    for t in range(T):                    # fully unrolled: T is small & static
        gi0 = gi0_all[t * M:(t + 1) * M, :]                        # [M, 3H]
        # Merged recurrent matmul for both layers (depends only on prev state).
        hh = jnp.concatenate([h1, h2], axis=1)                     # [M, 2H]
        gh = jnp.dot(hh, w_rec, preferred_element_type=f32) + b_rec    # [M, 6H]
        h1 = gru_gates(gi0, gh[:, 0:G3], h1)
        gi1 = jnp.dot(h1, wih1_t, preferred_element_type=f32) + bih1   # [M, 3H]
        h2 = gru_gates(gi1, gh[:, G3:2 * G3], h2)

    # ---- fused linear heads: columns = [mu | d | v_0..v_{R-1}] ---------------
    heads = (jnp.dot(h2, w_heads_ref[...], preferred_element_type=f32)
             + b_heads_ref[...])                                   # [M, 2+R]
    mu_col = heads[:, 0:1]                                         # [M, 1]
    d_col = heads[:, 1:2]                                          # [M, 1]
    v_mat = heads[:, 2:2 + R]                                      # [M, R]

    y_col = y_ref[...]                                             # [M, 1]
    err_col = (y_col - mu_col) * jnp.exp(-0.5 * d_col)             # [M, 1]

    # ---- vectorized v@v^T statistics via reduction identities ---------------
    # With G = V V^T:  G[i,j] = v_i.v_j,  so
    #   weighted_errors_i = v_i.(sum_j e_j v_j) - e_i ||v_i||^2
    #   relevance_i       = v_i.(sum_j v_j)     -     ||v_i||^2
    feats_rows = []
    for b in range(B):                    # B is tiny & static
        lo = b * N
        Vb = v_mat[lo:lo + N, :]                                   # [N, R]
        eb = err_col[lo:lo + N, :]                                 # [N, 1]
        diag_b = jnp.sum(Vb * Vb, axis=1, keepdims=True)           # [N, 1]
        u_row = jnp.sum(Vb * eb, axis=0, keepdims=True)            # [1, R]
        vsum_row = jnp.sum(Vb, axis=0, keepdims=True)              # [1, R]
        we_b = jnp.sum(Vb * u_row, axis=1, keepdims=True) - eb * diag_b
        rel_b = jnp.sum(Vb * vsum_row, axis=1, keepdims=True) - diag_b
        # Leave-one-out unbiased std over errors excluding i (torch.std).
        s1 = jnp.sum(eb, keepdims=True)                            # [1, 1]
        s2 = jnp.sum(eb * eb, keepdims=True)                       # [1, 1]
        loo_mean = (s1 - eb) / (N - 1)
        loo_var = (s2 - eb * eb - (N - 1) * loo_mean * loo_mean) / (N - 2)
        std_b = jnp.sqrt(jnp.maximum(loo_var, 0.0))
        feats_rows.append(jnp.concatenate(
            [mu_col[lo:lo + N, :], d_col[lo:lo + N, :], we_b, rel_b, std_b],
            axis=1))                                               # [N, 5]
    feats = jnp.concatenate(feats_rows, axis=0)                    # [M, 5]

    # ---- revision MLP + fused (mean_final, sigma_final) heads ----------------
    hidden = jnp.maximum(
        jnp.dot(feats, wrev_ref[...], preferred_element_type=f32) + brev_ref[...],
        0.0)                                                       # [M, REV]
    outs = (jnp.dot(hidden, w_fin_ref[...], preferred_element_type=f32)
            + b_fin_ref[...])                                      # [M, 2]
    mu_f = outs[:, 0:1]                                            # mean_final
    logsig = outs[:, 1:2]                                          # log sigma
    resid = y_col - mu_f

    # temp.mean() == mean_b(quad_b) + sum_{b,i} log_sigma (log-sigma NOT /B).
    loss_terms = resid * resid * jnp.exp(-logsig) * (1.0 / B) + logsig   # [M, 1]
    out_ref[...] = jnp.sum(loss_terms, keepdims=True)              # [1, 1]


# ----------------------------------------------------------------------------
# Wrapper: repack PyTorch-oriented parameters into row-major kernel operands.
# ----------------------------------------------------------------------------
def _prep_args(params, x, y):
    B, N, T = x.shape
    M = B * N
    H = params["whh0"].shape[1]
    R = params["wv"].shape[0]

    x_col = jnp.transpose(x.reshape(M, T)).reshape(T * M, 1)       # time-major rows
    y_col = y.reshape(M, 1)

    wih0_row = params["wih0"].reshape(1, 3 * H)                    # input_size == 1
    bih0_row = params["bih0"].reshape(1, 3 * H)

    # Block-diagonal merged recurrent weight: [2H, 6H]
    z = jnp.zeros((H, 3 * H), jnp.float32)
    w_rec = jnp.concatenate(
        [jnp.concatenate([params["whh0"].T, z], axis=1),
         jnp.concatenate([z, params["whh1"].T], axis=1)], axis=0)
    b_rec = jnp.concatenate([params["bhh0"].reshape(1, 3 * H),
                             params["bhh1"].reshape(1, 3 * H)], axis=1)

    wih1_t = params["wih1"].T                                      # [H, 3H]
    bih1_row = params["bih1"].reshape(1, 3 * H)

    w_heads_t = jnp.concatenate(
        [params["wm"], params["wd"], params["wv"]], axis=0).T      # [H, 2+R]
    b_heads_row = jnp.concatenate(
        [params["bm"], params["bd"], params["bv"]], axis=0).reshape(1, 2 + R)

    w_fin_t = jnp.concatenate([params["wmf"], params["wsf"]], axis=0).T   # [REV, 2]
    b_fin = jnp.concatenate([params["bmf"], params["bsf"]], axis=1)       # [1, 2]

    args = (x_col, y_col, wih0_row, bih0_row, w_rec, b_rec, wih1_t, bih1_row,
            w_heads_t, b_heads_row, params["wrev_t"], params["brev"],
            w_fin_t, b_fin)
    dims = dict(B=B, N=N, T=T, H=H, R=R)
    return args, dims


@jax.jit
def forecast_forward(params, x, y):
    """Pallas forward pass. x: [B, N, T], y: [B, N, 1]. Returns scalar loss."""
    args, d = _prep_args(params, x, y)
    kernel = functools.partial(_forecast_kernel,
                               d["B"], d["N"], d["T"], d["H"], d["R"])
    out = pl.pallas_call(
        kernel,
        out_shape=jax.ShapeDtypeStruct((1, 1), jnp.float32),
        in_specs=[pl.BlockSpec(memory_space=pltpu.MemorySpace.VMEM)] * len(args),
        out_specs=pl.BlockSpec(memory_space=pltpu.MemorySpace.VMEM),
    )(*args)
    return out[0, 0]
    # TODO(synk): for v7x with many independent (x, y) problems, add a leading
    # "parallel" grid axis so both TensorCores are used; a single tiny problem
    # cannot fill even one core.


# ----------------------------------------------------------------------------
# Independent pure-XLA reference (mirrors the PyTorch forward) for cross-check.
# ----------------------------------------------------------------------------
@jax.jit
def forecast_forward_reference(params, x, y):
    B, N, T = x.shape
    H = params["whh0"].shape[1]
    R = params["wv"].shape[0]
    M = B * N
    xs = jnp.transpose(x.reshape(M, T))                            # [T, M]

    def cell(h, gi, whh, bhh):
        gh = h @ whh.T + bhh.reshape(1, -1)
        r = jax.nn.sigmoid(gi[:, :H] + gh[:, :H])
        z = jax.nn.sigmoid(gi[:, H:2 * H] + gh[:, H:2 * H])
        n = jnp.tanh(gi[:, 2 * H:] + r * gh[:, 2 * H:])
        return (1.0 - z) * n + z * h

    h1 = jnp.zeros((M, H), jnp.float32)
    h2 = jnp.zeros((M, H), jnp.float32)
    for t in range(T):
        xt = xs[t][:, None]
        gi0 = xt @ params["wih0"].T + params["bih0"].reshape(1, -1)
        h1 = cell(h1, gi0, params["whh0"], params["bhh0"])
        gi1 = h1 @ params["wih1"].T + params["bih1"].reshape(1, -1)
        h2 = cell(h2, gi1, params["whh1"], params["bhh1"])

    mu = (h2 @ params["wm"].T + params["bm"].T).reshape(B, N)
    dd = (h2 @ params["wd"].T + params["bd"].T).reshape(B, N)
    v = (h2 @ params["wv"].T + params["bv"].T).reshape(B, N, R)
    G = jnp.einsum("bir,bjr->bij", v, v)                           # torch.bmm(v, v^T)
    yy = y.reshape(B, N)
    err = (yy - mu) / jnp.exp(dd / 2.0)
    diag = jnp.einsum("bii->bi", G)
    we = jnp.einsum("bij,bj->bi", G, err) - err * diag
    rel = jnp.sum(G, axis=-1) - diag
    s1 = jnp.sum(err, axis=-1, keepdims=True)
    s2 = jnp.sum(err * err, axis=-1, keepdims=True)
    loo_mean = (s1 - err) / (N - 1)
    loo_var = (s2 - err * err - (N - 1) * loo_mean * loo_mean) / (N - 2)
    std = jnp.sqrt(jnp.maximum(loo_var, 0.0))
    feats = jnp.stack([mu, dd, we, rel, std], axis=-1).reshape(M, 5)
    hidden = jax.nn.relu(feats @ params["wrev_t"] + params["brev"])
    mu_f = (hidden @ params["wmf"].T + params["bmf"]).reshape(B, N)
    logsig = (hidden @ params["wsf"].T + params["bsf"]).reshape(B, N)
    quad = jnp.sum((yy - mu_f) ** 2 * jnp.exp(-logsig), axis=-1)   # [B]
    return jnp.mean(quad) + jnp.sum(logsig)


# ----------------------------------------------------------------------------
# Deterministic parameter init (shapes match ForecastModel.__init__).
# ----------------------------------------------------------------------------
def init_params(key, hidden_dim=32, rank=16, revision_size=32):
    H, R, REV = hidden_dim, rank, revision_size
    keys = jax.random.split(key, 20)

    def u(k, shape, scale):
        return jax.random.uniform(k, shape, jnp.float32, -scale, scale)

    kg = 1.0 / float(H) ** 0.5
    kr = 1.0 / float(5) ** 0.5
    kf = 1.0 / float(REV) ** 0.5
    return dict(
        # GRU layer 0 (input_size=1) and layer 1; gate order r,z,n.
        wih0=u(keys[0], (3 * H, 1), kg), whh0=u(keys[1], (3 * H, H), kg),
        bih0=u(keys[2], (3 * H, 1), kg), bhh0=u(keys[3], (3 * H, 1), kg),
        wih1=u(keys[4], (3 * H, H), kg), whh1=u(keys[5], (3 * H, H), kg),
        bih1=u(keys[6], (3 * H, 1), kg), bhh1=u(keys[7], (3 * H, 1), kg),
        # mean / d / v heads (Linear(H,1), Linear(H,1), Linear(H,R))
        wm=u(keys[8], (1, H), kg), bm=u(keys[9], (1, 1), kg),
        wd=u(keys[10], (1, H), kg), bd=u(keys[11], (1, 1), kg),
        wv=u(keys[12], (R, H), kg), bv=u(keys[13], (R, 1), kg),
        # revision_network: Linear(5, REV) stored transposed [in, out], + ReLU
        wrev_t=u(keys[14], (5, REV), kr), brev=u(keys[15], (1, REV), kr),
        # mean_final / sigma_final: Linear(REV, 1)
        wmf=u(keys[16], (1, REV), kf), bmf=u(keys[17], (1, 1), kf),
        wsf=u(keys[18], (1, REV), kf), bsf=u(keys[19], (1, 1), kf),
    )


if __name__ == "__main__":
    B, N, T = 2, 4, 8              # batch, num_series, seq_len
    HIDDEN, RANK = 32, 16          # small but consistent with the module

    key = jax.random.PRNGKey(0)
    kx, ky, kp = jax.random.split(key, 3)
    x = jax.random.normal(kx, (B, N, T), dtype=jnp.float32)
    y = jax.random.normal(ky, (B, N, 1), dtype=jnp.float32)
    params = init_params(kp, hidden_dim=HIDDEN, rank=RANK)

    loss = jax.block_until_ready(forecast_forward(params, x, y))
    ref = jax.block_until_ready(forecast_forward_reference(params, x, y))

    assert jnp.isfinite(loss), loss
    assert jnp.allclose(loss, ref, rtol=1e-3, atol=1e-3), (loss, ref)

    print("KERNEL_OK")
</pallas_src>

<mosaic_0001>
module attributes {stable_mosaic.version = 11 : i64} {
  func.func @_forecast_kernel(%arg0: memref<64x1xf32, #tpu.memory_space<vmem>>, %arg1: memref<8x1xf32, #tpu.memory_space<vmem>>, %arg2: memref<1x96xf32, #tpu.memory_space<vmem>>, %arg3: memref<1x96xf32, #tpu.memory_space<vmem>>, %arg4: memref<64x192xf32, #tpu.memory_space<vmem>>, %arg5: memref<1x192xf32, #tpu.memory_space<vmem>>, %arg6: memref<32x96xf32, #tpu.memory_space<vmem>>, %arg7: memref<1x96xf32, #tpu.memory_space<vmem>>, %arg8: memref<32x18xf32, #tpu.memory_space<vmem>>, %arg9: memref<1x18xf32, #tpu.memory_space<vmem>>, %arg10: memref<5x32xf32, #tpu.memory_space<vmem>>, %arg11: memref<1x32xf32, #tpu.memory_space<vmem>>, %arg12: memref<32x2xf32, #tpu.memory_space<vmem>>, %arg13: memref<1x2xf32, #tpu.memory_space<vmem>>, %arg14: memref<1x1xf32, #tpu.memory_space<vmem>>) attributes {dimension_semantics = [], scalar_prefetch = 0 : i64, scratch_operands = 0 : i64, tpu.core_type = #tpu.core_type<tc>} {
    %c0 = arith.constant 0 : index
    %c0_0 = arith.constant 0 : index
    %0 = vector.load %arg0[%c0, %c0_0] : memref<64x1xf32, #tpu.memory_space<vmem>>, vector<64x1xf32>
    %c0_1 = arith.constant 0 : index
    %c0_2 = arith.constant 0 : index
    %1 = vector.load %arg2[%c0_1, %c0_2] : memref<1x96xf32, #tpu.memory_space<vmem>>, vector<1x96xf32>
    %2 = vector.broadcast %0 : vector<64x1xf32> to vector<64x96xf32>
    %3 = vector.broadcast %1 : vector<1x96xf32> to vector<64x96xf32>
    %4 = arith.mulf %2, %3 : vector<64x96xf32>
    %c0_3 = arith.constant 0 : index
    %c0_4 = arith.constant 0 : index
    %5 = vector.load %arg3[%c0_3, %c0_4] : memref<1x96xf32, #tpu.memory_space<vmem>>, vector<1x96xf32>
    %6 = vector.broadcast %5 : vector<1x96xf32> to vector<64x96xf32>
    %7 = arith.addf %4, %6 : vector<64x96xf32>
    %c0_5 = arith.constant 0 : index
    %c0_6 = arith.constant 0 : index
    %8 = vector.load %arg4[%c0_5, %c0_6] : memref<64x192xf32, #tpu.memory_space<vmem>>, vector<64x192xf32>
    %c0_7 = arith.constant 0 : index
    %c0_8 = arith.constant 0 : index
    %9 = vector.load %arg5[%c0_7, %c0_8] : memref<1x192xf32, #tpu.memory_space<vmem>>, vector<1x192xf32>
    %c0_9 = arith.constant 0 : index
    %c0_10 = arith.constant 0 : index
    %10 = vector.load %arg6[%c0_9, %c0_10] : memref<32x96xf32, #tpu.memory_space<vmem>>, vector<32x96xf32>
    %c0_11 = arith.constant 0 : index
    %c0_12 = arith.constant 0 : index
    %11 = vector.load %arg7[%c0_11, %c0_12] : memref<1x96xf32, #tpu.memory_space<vmem>>, vector<1x96xf32>
    %cst = arith.constant 0.000000e+00 : f32
    %12 = vector.broadcast %cst : f32 to vector<8x32xf32>
    %cst_13 = arith.constant 0.000000e+00 : f32
    %13 = vector.broadcast %cst_13 : f32 to vector<8x32xf32>
    %14 = vector.extract_strided_slice %7 {offsets = [0, 0], sizes = [8, 96], strides = [1, 1]} : vector<64x96xf32> to vector<8x96xf32>
    %15 = tpu.concatenate %12, %13 in 1 : vector<8x32xf32>, vector<8x32xf32> -> vector<8x64xf32>
    %cst_14 = arith.constant dense<0.000000e+00> : vector<8x192xf32>
    %16 = tpu.matmul %15, %8, %cst_14 {dimension_numbers = #tpu.dot_dimension_numbers<[1], [0], [0], [1], [0, 0, 1, 1], [], []>} : vector<8x64xf32>, vector<64x192xf32>, vector<8x192xf32> -> vector<8x192xf32>
    %17 = vector.broadcast %9 : vector<1x192xf32> to vector<8x192xf32>
    %18 = arith.addf %16, %17 : vector<8x192xf32>
    %19 = vector.extract_strided_slice %18 {offsets = [0, 0], sizes = [8, 96], strides = [1, 1]} : vector<8x192xf32> to vector<8x96xf32>
    %20 = vector.extract_strided_slice %14 {offsets = [0, 0], sizes = [8, 32], strides = [1, 1]} : vector<8x96xf32> to vector<8x32xf32>
    %21 = vector.extract_strided_slice %19 {offsets = [0, 0], sizes = [8, 32], strides = [1, 1]} : vector<8x96xf32> to vector<8x32xf32>
    %22 = arith.addf %20, %21 : vector<8x32xf32>
    %23 = arith.negf %22 : vector<8x32xf32>
    %24 = math.exp %23 : vector<8x32xf32>
    %cst_15 = arith.constant 1.000000e+00 : f32
    %25 = vector.broadcast %cst_15 : f32 to vector<8x32xf32>
    %26 = arith.addf %25, %24 : vector<8x32xf32>
    %27 = arith.divf %25, %26 : vector<8x32xf32>
    %28 = vector.extract_strided_slice %14 {offsets = [0, 32], sizes = [8, 32], strides = [1, 1]} : vector<8x96xf32> to vector<8x32xf32>
    %29 = vector.extract_strided_slice %19 {offsets = [0, 32], sizes = [8, 32], strides = [1, 1]} : vector<8x96xf32> to vector<8x32xf32>
    %30 = arith.addf %28, %29 : vector<8x32xf32>
    %31 = arith.negf %30 : vector<8x32xf32>
    %32 = math.exp %31 : vector<8x32xf32>
    %cst_16 = arith.constant 1.000000e+00 : f32
    %33 = vector.broadcast %cst_16 : f32 to vector<8x32xf32>
    %34 = arith.addf %33, %32 : vector<8x32xf32>
    %35 = arith.divf %33, %34 : vector<8x32xf32>
    %36 = vector.extract_strided_slice %14 {offsets = [0, 64], sizes = [8, 32], strides = [1, 1]} : vector<8x96xf32> to vector<8x32xf32>
    %37 = vector.extract_strided_slice %19 {offsets = [0, 64], sizes = [8, 32], strides = [1, 1]} : vector<8x96xf32> to vector<8x32xf32>
    %38 = arith.mulf %27, %37 : vector<8x32xf32>
    %39 = arith.addf %36, %38 : vector<8x32xf32>
    %40 = math.tanh %39 : vector<8x32xf32>
    %cst_17 = arith.constant 1.000000e+00 : f32
    %41 = vector.broadcast %cst_17 : f32 to vector<8x32xf32>
    %42 = arith.subf %41, %35 : vector<8x32xf32>
    %43 = arith.mulf %42, %40 : vector<8x32xf32>
    %44 = arith.mulf %35, %12 : vector<8x32xf32>
    %45 = arith.addf %43, %44 : vector<8x32xf32>
    %cst_18 = arith.constant dense<0.000000e+00> : vector<8x96xf32>
    %46 = tpu.matmul %45, %10, %cst_18 {dimension_numbers = #tpu.dot_dimension_numbers<[1], [0], [0], [1], [0, 0, 1, 1], [], []>} : vector<8x32xf32>, vector<32x96xf32>, vector<8x96xf32> -> vector<8x96xf32>
    %47 = vector.broadcast %11 : vector<1x96xf32> to vector<8x96xf32>
    %48 = arith.addf %46, %47 : vector<8x96xf32>
    %49 = vector.extract_strided_slice %18 {offsets = [0, 96], sizes = [8, 96], strides = [1, 1]} : vector<8x192xf32> to vector<8x96xf32>
    %50 = vector.extract_strided_slice %48 {offsets = [0, 0], sizes = [8, 32], strides = [1, 1]} : vector<8x96xf32> to vector<8x32xf32>
    %51 = vector.extract_strided_slice %49 {offsets = [0, 0], sizes = [8, 32], strides = [1, 1]} : vector<8x96xf32> to vector<8x32xf32>
    %52 = arith.addf %50, %51 : vector<8x32xf32>
    %53 = arith.negf %52 : vector<8x32xf32>
    %54 = math.exp %53 : vector<8x32xf32>
    %cst_19 = arith.constant 1.000000e+00 : f32
    %55 = vector.broadcast %cst_19 : f32 to vector<8x32xf32>
    %56 = arith.addf %55, %54 : vector<8x32xf32>
    %57 = arith.divf %55, %56 : vector<8x32xf32>
    %58 = vector.extract_strided_slice %48 {offsets = [0, 32], sizes = [8, 32], strides = [1, 1]} : vector<8x96xf32> to vector<8x32xf32>
    %59 = vector.extract_strided_slice %49 {offsets = [0, 32], sizes = [8, 32], strides = [1, 1]} : vector<8x96xf32> to vector<8x32xf32>
    %60 = arith.addf %58, %59 : vector<8x32xf32>
    %61 = arith.negf %60 : vector<8x32xf32>
    %62 = math.exp %61 : vector<8x32xf32>
    %cst_20 = arith.constant 1.000000e+00 : f32
    %63 = vector.broadcast %cst_20 : f32 to vector<8x32xf32>
    %64 = arith.addf %63, %62 : vector<8x32xf32>
    %65 = arith.divf %63, %64 : vector<8x32xf32>
    %66 = vector.extract_strided_slice %48 {offsets = [0, 64], sizes = [8, 32], strides = [1, 1]} : vector<8x96xf32> to vector<8x32xf32>
    %67 = vector.extract_strided_slice %49 {offsets = [0, 64], sizes = [8, 32], strides = [1, 1]} : vector<8x96xf32> to vector<8x32xf32>
    %68 = arith.mulf %57, %67 : vector<8x32xf32>
    %69 = arith.addf %66, %68 : vector<8x32xf32>
    %70 = math.tanh %69 : vector<8x32xf32>
    %cst_21 = arith.constant 1.000000e+00 : f32
    %71 = vector.broadcast %cst_21 : f32 to vector<8x32xf32>
    %72 = arith.subf %71, %65 : vector<8x32xf32>
    %73 = arith.mulf %72, %70 : vector<8x32xf32>
    %74 = arith.mulf %65, %13 : vector<8x32xf32>
    %75 = arith.addf %73, %74 : vector<8x32xf32>
    %76 = vector.extract_strided_slice %7 {offsets = [8, 0], sizes = [8, 96], strides = [1, 1]} : vector<64x96xf32> to vector<8x96xf32>
    %77 = tpu.concatenate %45, %75 in 1 : vector<8x32xf32>, vector<8x32xf32> -> vector<8x64xf32>
    %cst_22 = arith.constant dense<0.000000e+00> : vector<8x192xf32>
    %78 = tpu.matmul %77, %8, %cst_22 {dimension_numbers = #tpu.dot_dimension_numbers<[1], [0], [0], [1], [0, 0, 1, 1], [], []>} : vector<8x64xf32>, vector<64x192xf32>, vector<8x192xf32> -> vector<8x192xf32>
    %79 = vector.broadcast %9 : vector<1x192xf32> to vector<8x192xf32>
    %80 = arith.addf %78, %79 : vector<8x192xf32>
    %81 = vector.extract_strided_slice %80 {offsets = [0, 0], sizes = [8, 96], strides = [1, 1]} : vector<8x192xf32> to vector<8x96xf32>
    %82 = vector.extract_strided_slice %76 {offsets = [0, 0], sizes = [8, 32], strides = [1, 1]} : vector<8x96xf32> to vector<8x32xf32>
    %83 = vector.extract_strided_slice %81 {offsets = [0, 0], sizes = [8, 32], strides = [1, 1]} : vector<8x96xf32> to vector<8x32xf32>
    %84 = arith.addf %82, %83 : vector<8x32xf32>
    %85 = arith.negf %84 : vector<8x32xf32>
    %86 = math.exp %85 : vector<8x32xf32>
    %cst_23 = arith.constant 1.000000e+00 : f32
    %87 = vector.broadcast %cst_23 : f32 to vector<8x32xf32>
    %88 = arith.addf %87, %86 : vector<8x32xf32>
    %89 = arith.divf %87, %88 : vector<8x32xf32>
    %90 = vector.extract_strided_slice %76 {offsets = [0, 32], sizes = [8, 32], strides = [1, 1]} : vector<8x96xf32> to vector<8x32xf32>
    %91 = vector.extract_strided_slice %81 {offsets = [0, 32], sizes = [8, 32], strides = [1, 1]} : vector<8x96xf32> to vector<8x32xf32>
    %92 = arith.addf %90, %91 : vector<8x32xf32>
    %93 = arith.negf %92 : vector<8x32xf32>
    %94 = math.exp %93 : vector<8x32xf32>
    %cst_24 = arith.constant 1.000000e+00 : f32
    %95 = vector.broadcast %cst_24 : f32 to vector<8x32xf32>
    %96 = arith.addf %95, %94 : vector<8x32xf32>
    %97 = arith.divf %95, %96 : vector<8x32xf32>
    %98 = vector.extract_strided_slice %76 {offsets = [0, 64], sizes = [8, 32], strides = [1, 1]} : vector<8x96xf32> to vector<8x32xf32>
    %99 = vector.extract_strided_slice %81 {offsets = [0, 64], sizes = [8, 32], strides = [1, 1]} : vector<8x96xf32> to vector<8x32xf32>
    %100 = arith.mulf %89, %99 : vector<8x32xf32>
    %101 = arith.addf %98, %100 : vector<8x32xf32>
    %102 = math.tanh %101 : vector<8x32xf32>
    %cst_25 = arith.constant 1.000000e+00 : f32
    %103 = vector.broadcast %cst_25 : f32 to vector<8x32xf32>
    %104 = arith.subf %103, %97 : vector<8x32xf32>
    %105 = arith.mulf %104, %102 : vector<8x32xf32>
    %106 = arith.mulf %97, %45 : vector<8x32xf32>
    %107 = arith.addf %105, %106 : vector<8x32xf32>
    %cst_26 = arith.constant dense<0.000000e+00> : vector<8x96xf32>
    %108 = tpu.matmul %107, %10, %cst_26 {dimension_numbers = #tpu.dot_dimension_numbers<[1], [0], [0], [1], [0, 0, 1, 1], [], []>} : vector<8x32xf32>, vector<32x96xf32>, vector<8x96xf32> -> vector<8x96xf32>
    %109 = vector.broadcast %11 : vector<1x96xf32> to vector<8x96xf32>
    %110 = arith.addf %108, %109 : vector<8x96xf32>
    %111 = vector.extract_strided_slice %80 {offsets = [0, 96], sizes = [8, 96], strides = [1, 1]} : vector<8x192xf32> to vector<8x96xf32>
    %112 = vector.extract_strided_slice %110 {offsets = [0, 0], sizes = [8, 32], strides = [1, 1]} : vector<8x96xf32> to vector<8x32xf32>
    %113 = vector.extract_strided_slice %111 {offsets = [0, 0], sizes = [8, 32], strides = [1, 1]} : vector<8x96xf32> to vector<8x32xf32>
    %114 = arith.addf %112, %113 : vector<8x32xf32>
    %115 = arith.negf %114 : vector<8x32xf32>
    %116 = math.exp %115 : vector<8x32xf32>
    %cst_27 = arith.constant 1.000000e+00 : f32
    %117 = vector.broadcast %cst_27 : f32 to vector<8x32xf32>
    %118 = arith.addf %117, %116 : vector<8x32xf32>
    %119 = arith.divf %117, %118 : vector<8x32xf32>
    %120 = vector.extract_strided_slice %110 {offsets = [0, 32], sizes = [8, 32], strides = [1, 1]} : vector<8x96xf32> to vector<8x32xf32>
    %121 = vector.extract_strided_slice %111 {offsets = [0, 32], sizes = [8, 32], strides = [1, 1]} : vector<8x96xf32> to vector<8x32xf32>
    %122 = arith.addf %120, %121 : vector<8x32xf32>
    %123 = arith.negf %122 : vector<8x32xf32>
    %124 = math.exp %123 : vector<8x32xf32>
    %cst_28 = arith.constant 1.000000e+00 : f32
    %125 = vector.broadcast %cst_28 : f32 to vector<8x32xf32>
    %126 = arith.addf %125, %124 : vector<8x32xf32>
    %127 = arith.divf %125, %126 : vector<8x32xf32>
    %128 = vector.extract_strided_slice %110 {offsets = [0, 64], sizes = [8, 32], strides = [1, 1]} : vector<8x96xf32> to vector<8x32xf32>
    %129 = vector.extract_strided_slice %111 {offsets = [0, 64], sizes = [8, 32], strides = [1, 1]} : vector<8x96xf32> to vector<8x32xf32>
    %130 = arith.mulf %119, %129 : vector<8x32xf32>
    %131 = arith.addf %128, %130 : vector<8x32xf32>
    %132 = math.tanh %131 : vector<8x32xf32>
    %cst_29 = arith.constant 1.000000e+00 : f32
    %133 = vector.broadcast %cst_29 : f32 to vector<8x32xf32>
    %134 = arith.subf %133, %127 : vector<8x32xf32>
    %135 = arith.mulf %134, %132 : vector<8x32xf32>
    %136 = arith.mulf %127, %75 : vector<8x32xf32>
    %137 = arith.addf %135, %136 : vector<8x32xf32>
    %138 = vector.extract_strided_slice %7 {offsets = [16, 0], sizes = [8, 96], strides = [1, 1]} : vector<64x96xf32> to vector<8x96xf32>
    %139 = tpu.concatenate %107, %137 in 1 : vector<8x32xf32>, vector<8x32xf32> -> vector<8x64xf32>
    %cst_30 = arith.constant dense<0.000000e+00> : vector<8x192xf32>
    %140 = tpu.matmul %139, %8, %cst_30 {dimension_numbers = #tpu.dot_dimension_numbers<[1], [0], [0], [1], [0, 0, 1, 1], [], []>} : vector<8x64xf32>, vector<64x192xf32>, vector<8x192xf32> -> vector<8x192xf32>
    %141 = vector.broadcast %9 : vector<1x192xf32> to vector<8x192xf32>
    %142 = arith.addf %140, %141 : vector<8x192xf32>
    %143 = vector.extract_strided_slice %142 {offsets = [0, 0], sizes = [8, 96], strides = [1, 1]} : vector<8x192xf32> to vector<8x96xf32>
    %144 = vector.extract_strided_slice %138 {offsets = [0, 0], sizes = [8, 32], strides = [1, 1]} : vector<8x96xf32> to vector<8x32xf32>
    %145 = vector.extract_strided_slice %143 {offsets = [0, 0], sizes = [8, 32], strides = [1, 1]} : vector<8x96xf32> to vector<8x32xf32>
    %146 = arith.addf %144, %145 : vector<8x32xf32>
    %147 = arith.negf %146 : vector<8x32xf32>
    %148 = math.exp %147 : vector<8x32xf32>
    %cst_31 = arith.constant 1.000000e+00 : f32
    %149 = vector.broadcast %cst_31 : f32 to vector<8x32xf32>
    %150 = arith.addf %149, %148 : vector<8x32xf32>
    %151 = arith.divf %149, %150 : vector<8x32xf32>
    %152 = vector.extract_strided_slice %138 {offsets = [0, 32], sizes = [8, 32], strides = [1, 1]} : vector<8x96xf32> to vector<8x32xf32>
    %153 = vector.extract_strided_slice %143 {offsets = [0, 32], sizes = [8, 32], strides = [1, 1]} : vector<8x96xf32> to vector<8x32xf32>
    %154 = arith.addf %152, %153 : vector<8x32xf32>
    %155 = arith.negf %154 : vector<8x32xf32>
    %156 = math.exp %155 : vector<8x32xf32>
    %cst_32 = arith.constant 1.000000e+00 : f32
    %157 = vector.broadcast %cst_32 : f32 to vector<8x32xf32>
    %158 = arith.addf %157, %156 : vector<8x32xf32>
    %159 = arith.divf %157, %158 : vector<8x32xf32>
    %160 = vector.extract_strided_slice %138 {offsets = [0, 64], sizes = [8, 32], strides = [1, 1]} : vector<8x96xf32> to vector<8x32xf32>
    %161 = vector.extract_strided_slice %143 {offsets = [0, 64], sizes = [8, 32], strides = [1, 1]} : vector<8x96xf32> to vector<8x32xf32>
    %162 = arith.mulf %151, %161 : vector<8x32xf32>
    %163 = arith.addf %160, %162 : vector<8x32xf32>
    %164 = math.tanh %163 : vector<8x32xf32>
    %cst_33 = arith.constant 1.000000e+00 : f32
    %165 = vector.broadcast %cst_33 : f32 to vector<8x32xf32>
    %166 = arith.subf %165, %159 : vector<8x32xf32>
    %167 = arith.mulf %166, %164 : vector<8x32xf32>
    %168 = arith.mulf %159, %107 : vector<8x32xf32>
    %169 = arith.addf %167, %168 : vector<8x32xf32>
    %cst_34 = arith.constant dense<0.000000e+00> : vector<8x96xf32>
    %170 = tpu.matmul %169, %10, %cst_34 {dimension_numbers = #tpu.dot_dimension_numbers<[1], [0], [0], [1], [0, 0, 1, 1], [], []>} : vector<8x32xf32>, vector<32x96xf32>, vector<8x96xf32> -> vector<8x96xf32>
    %171 = vector.broadcast %11 : vector<1x96xf32> to vector<8x96xf32>
    %172 = arith.addf %170, %171 : vector<8x96xf32>
    %173 = vector.extract_strided_slice %142 {offsets = [0, 96], sizes = [8, 96], strides = [1, 1]} : vector<8x192xf32> to vector<8x96xf32>
    %174 = vector.extract_strided_slice %172 {offsets = [0, 0], sizes = [8, 32], strides = [1, 1]} : vector<8x96xf32> to vector<8x32xf32>
    %175 = vector.extract_strided_slice %173 {offsets = [0, 0], sizes = [8, 32], strides = [1, 1]} : vector<8x96xf32> to vector<8x32xf32>
    %176 = arith.addf %174, %175 : vector<8x32xf32>
    %177 = arith.negf %176 : vector<8x32xf32>
    %178 = math.exp %177 : vector<8x32xf32>
    %cst_35 = arith.constant 1.000000e+00 : f32
    %179 = vector.broadcast %cst_35 : f32 to vector<8x32xf32>
    %180 = arith.addf %179, %178 : vector<8x32xf32>
    %181 = arith.divf %179, %180 : vector<8x32xf32>
    %182 = vector.extract_strided_slice %172 {offsets = [0, 32], sizes = [8, 32], strides = [1, 1]} : vector<8x96xf32> to vector<8x32xf32>
    %183 = vector.extract_strided_slice %173 {offsets = [0, 32], sizes = [8, 32], strides = [1, 1]} : vector<8x96xf32> to vector<8x32xf32>
    %184 = arith.addf %182, %183 : vector<8x32xf32>
    %185 = arith.negf %184 : vector<8x32xf32>
    %186 = math.exp %185 : vector<8x32xf32>
    %cst_36 = arith.constant 1.000000e+00 : f32
    %187 = vector.broadcast %cst_36 : f32 to vector<8x32xf32>
    %188 = arith.addf %187, %186 : vector<8x32xf32>
    %189 = arith.divf %187, %188 : vector<8x32xf32>
    %190 = vector.extract_strided_slice %172 {offsets = [0, 64], sizes = [8, 32], strides = [1, 1]} : vector<8x96xf32> to vector<8x32xf32>
    %191 = vector.extract_strided_slice %173 {offsets = [0, 64], sizes = [8, 32], strides = [1, 1]} : vector<8x96xf32> to vector<8x32xf32>
    %192 = arith.mulf %181, %191 : vector<8x32xf32>
    %193 = arith.addf %190, %192 : vector<8x32xf32>
    %194 = math.tanh %193 : vector<8x32xf32>
    %cst_37 = arith.constant 1.000000e+00 : f32
    %195 = vector.broadcast %cst_37 : f32 to vector<8x32xf32>
    %196 = arith.subf %195, %189 : vector<8x32xf32>
    %197 = arith.mulf %196, %194 : vector<8x32xf32>
    %198 = arith.mulf %189, %137 : vector<8x32xf32>
    %199 = arith.addf %197, %198 : vector<8x32xf32>
    %200 = vector.extract_strided_slice %7 {offsets = [24, 0], sizes = [8, 96], strides = [1, 1]} : vector<64x96xf32> to vector<8x96xf32>
    %201 = tpu.concatenate %169, %199 in 1 : vector<8x32xf32>, vector<8x32xf32> -> vector<8x64xf32>
    %cst_38 = arith.constant dense<0.000000e+00> : vector<8x192xf32>
    %202 = tpu.matmul %201, %8, %cst_38 {dimension_numbers = #tpu.dot_dimension_numbers<[1], [0], [0], [1], [0, 0, 1, 1], [], []>} : vector<8x64xf32>, vector<64x192xf32>, vector<8x192xf32> -> vector<8x192xf32>
    %203 = vector.broadcast %9 : vector<1x192xf32> to vector<8x192xf32>
    %204 = arith.addf %202, %203 : vector<8x192xf32>
    %205 = vector.extract_strided_slice %204 {offsets = [0, 0], sizes = [8, 96], strides = [1, 1]} : vector<8x192xf32> to vector<8x96xf32>
    %206 = vector.extract_strided_slice %200 {offsets = [0, 0], sizes = [8, 32], strides = [1, 1]} : vector<8x96xf32> to vector<8x32xf32>
    %207 = vector.extract_strided_slice %205 {offsets = [0, 0], sizes = [8, 32], strides = [1, 1]} : vector<8x96xf32> to vector<8x32xf32>
    %208 = arith.addf %206, %207 : vector<8x32xf32>
    %209 = arith.negf %208 : vector<8x32xf32>
    %210 = math.exp %209 : vector<8x32xf32>
    %cst_39 = arith.constant 1.000000e+00 : f32
    %211 = vector.broadcast %cst_39 : f32 to vector<8x32xf32>
    %212 = arith.addf %211, %210 : vector<8x32xf32>
    %213 = arith.divf %211, %212 : vector<8x32xf32>
    %214 = vector.extract_strided_slice %200 {offsets = [0, 32], sizes = [8, 32], strides = [1, 1]} : vector<8x96xf32> to vector<8x32xf32>
    %215 = vector.extract_strided_slice %205 {offsets = [0, 32], sizes = [8, 32], strides = [1, 1]} : vector<8x96xf32> to vector<8x32xf32>
    %216 = arith.addf %214, %215 : vector<8x32xf32>
    %217 = arith.negf %216 : vector<8x32xf32>
    %218 = math.exp %217 : vector<8x32xf32>
    %cst_40 = arith.constant 1.000000e+00 : f32
    %219 = vector.broadcast %cst_40 : f32 to vector<8x32xf32>
    %220 = arith.addf %219, %218 : vector<8x32xf32>
    %221 = arith.divf %219, %220 : vector<8x32xf32>
    %222 = vector.extract_strided_slice %200 {offsets = [0, 64], sizes = [8, 32], strides = [1, 1]} : vector<8x96xf32> to vector<8x32xf32>
    %223 = vector.extract_strided_slice %205 {offsets = [0, 64], sizes = [8, 32], strides = [1, 1]} : vector<8x96xf32> to vector<8x32xf32>
    %224 = arith.mulf %213, %223 : vector<8x32xf32>
    %225 = arith.addf %222, %224 : vector<8x32xf32>
    %226 = math.tanh %225 : vector<8x32xf32>
    %cst_41 = arith.constant 1.000000e+00 : f32
    %227 = vector.broadcast %cst_41 : f32 to vector<8x32xf32>
    %228 = arith.subf %227, %221 : vector<8x32xf32>
    %229 = arith.mulf %228, %226 : vector<8x32xf32>
    %230 = arith.mulf %221, %169 : vector<8x32xf32>
    %231 = arith.addf %229, %230 : vector<8x32xf32>
    %cst_42 = arith.constant dense<0.000000e+00> : vector<8x96xf32>
    %232 = tpu.matmul %231, %10, %cst_42 {dimension_numbers = #tpu.dot_dimension_numbers<[1], [0], [0], [1], [0, 0, 1, 1], [], []>} : vector<8x32xf32>, vector<32x96xf32>, vector<8x96xf32> -> vector<8x96xf32>
    %233 = vector.broadcast %11 : vector<1x96xf32> to vector<8x96xf32>
    %234 = arith.addf %232, %233 : vector<8x96xf32>
    %235 = vector.extract_strided_slice %204 {offsets = [0, 96], sizes = [8, 96], strides = [1, 1]} : vector<8x192xf32> to vector<8x96xf32>
    %236 = vector.extract_strided_slice %234 {offsets = [0, 0], sizes = [8, 32], strides = [1, 1]} : vector<8x96xf32> to vector<8x32xf32>
    %237 = vector.extract_strided_slice %235 {offsets = [0, 0], sizes = [8, 32], strides = [1, 1]} : vector<8x96xf32> to vector<8x32xf32>
    %238 = arith.addf %236, %237 : vector<8x32xf32>
    %239 = arith.negf %238 : vector<8x32xf32>
    %240 = math.exp %239 : vector<8x32xf32>
    %cst_43 = arith.constant 1.000000e+00 : f32
    %241 = vector.broadcast %cst_43 : f32 to vector<8x32xf32>
    %242 = arith.addf %241, %240 : vector<8x32xf32>
    %243 = arith.divf %241, %242 : vector<8x32xf32>
    %244 = vector.extract_strided_slice %234 {offsets = [0, 32], sizes = [8, 32], strides = [1, 1]} : vector<8x96xf32> to vector<8x32xf32>
    %245 = vector.extract_strided_slice %235 {offsets = [0, 32], sizes = [8, 32], strides = [1, 1]} : vector<8x96xf32> to vector<8x32xf32>
    %246 = arith.addf %244, %245 : vector<8x32xf32>
    %247 = arith.negf %246 : vector<8x32xf32>
    %248 = math.exp %247 : vector<8x32xf32>
    %cst_44 = arith.constant 1.000000e+00 : f32
    %249 = vector.broadcast %cst_44 : f32 to vector<8x32xf32>
    %250 = arith.addf %249, %248 : vector<8x32xf32>
    %251 = arith.divf %249, %250 : vector<8x32xf32>
    %252 = vector.extract_strided_slice %234 {offsets = [0, 64], sizes = [8, 32], strides = [1, 1]} : vector<8x96xf32> to vector<8x32xf32>
    %253 = vector.extract_strided_slice %235 {offsets = [0, 64], sizes = [8, 32], strides = [1, 1]} : vector<8x96xf32> to vector<8x32xf32>
    %254 = arith.mulf %243, %253 : vector<8x32xf32>
    %255 = arith.addf %252, %254 : vector<8x32xf32>
    %256 = math.tanh %255 : vector<8x32xf32>
    %cst_45 = arith.constant 1.000000e+00 : f32
    %257 = vector.broadcast %cst_45 : f32 to vector<8x32xf32>
    %258 = arith.subf %257, %251 : vector<8x32xf32>
    %259 = arith.mulf %258, %256 : vector<8x32xf32>
    %260 = arith.mulf %251, %199 : vector<8x32xf32>
    %261 = arith.addf %259, %260 : vector<8x32xf32>
    %262 = vector.extract_strided_slice %7 {offsets = [32, 0], sizes = [8, 96], strides = [1, 1]} : vector<64x96xf32> to vector<8x96xf32>
    %263 = tpu.concatenate %231, %261 in 1 : vector<8x32xf32>, vector<8x32xf32> -> vector<8x64xf32>
    %cst_46 = arith.constant dense<0.000000e+00> : vector<8x192xf32>
    %264 = tpu.matmul %263, %8, %cst_46 {dimension_numbers = #tpu.dot_dimension_numbers<[1], [0], [0], [1], [0, 0, 1, 1], [], []>} : vector<8x64xf32>, vector<64x192xf32>, vector<8x192xf32> -> vector<8x192xf32>
    %265 = vector.broadcast %9 : vector<1x192xf32> to vector<8x192xf32>
    %266 = arith.addf %264, %265 : vector<8x192xf32>
    %267 = vector.extract_strided_slice %266 {offsets = [0, 0], sizes = [8, 96], strides = [1, 1]} : vector<8x192xf32> to vector<8x96xf32>
    %268 = vector.extract_strided_slice %262 {offsets = [0, 0], sizes = [8, 32], strides = [1, 1]} : vector<8x96xf32> to vector<8x32xf32>
    %269 = vector.extract_strided_slice %267 {offsets = [0, 0], sizes = [8, 32], strides = [1, 1]} : vector<8x96xf32> to vector<8x32xf32>
    %270 = arith.addf %268, %269 : vector<8x32xf32>
    %271 = arith.negf %270 : vector<8x32xf32>
    %272 = math.exp %271 : vector<8x32xf32>
    %cst_47 = arith.constant 1.000000e+00 : f32
    %273 = vector.broadcast %cst_47 : f32 to vector<8x32xf32>
    %274 = arith.addf %273, %272 : vector<8x32xf32>
    %275 = arith.divf %273, %274 : vector<8x32xf32>
    %276 = vector.extract_strided_slice %262 {offsets = [0, 32], sizes = [8, 32], strides = [1, 1]} : vector<8x96xf32> to vector<8x32xf32>
    %277 = vector.extract_strided_slice %267 {offsets = [0, 32], sizes = [8, 32], strides = [1, 1]} : vector<8x96xf32> to vector<8x32xf32>
    %278 = arith.addf %276, %277 : vector<8x32xf32>
    %279 = arith.negf %278 : vector<8x32xf32>
    %280 = math.exp %279 : vector<8x32xf32>
    %cst_48 = arith.constant 1.000000e+00 : f32
    %281 = vector.broadcast %cst_48 : f32 to vector<8x32xf32>
    %282 = arith.addf %281, %280 : vector<8x32xf32>
    %283 = arith.divf %281, %282 : vector<8x32xf32>
    %284 = vector.extract_strided_slice %262 {offsets = [0, 64], sizes = [8, 32], strides = [1, 1]} : vector<8x96xf32> to vector<8x32xf32>
    %285 = vector.extract_strided_slice %267 {offsets = [0, 64], sizes = [8, 32], strides = [1, 1]} : vector<8x96xf32> to vector<8x32xf32>
    %286 = arith.mulf %275, %285 : vector<8x32xf32>
    %287 = arith.addf %284, %286 : vector<8x32xf32>
    %288 = math.tanh %287 : vector<8x32xf32>
    %cst_49 = arith.constant 1.000000e+00 : f32
    %289 = vector.broadcast %cst_49 : f32 to vector<8x32xf32>
    %290 = arith.subf %289, %283 : vector<8x32xf32>
    %291 = arith.mulf %290, %288 : vector<8x32xf32>
    %292 = arith.mulf %283, %231 : vector<8x32xf32>
    %293 = arith.addf %291, %292 : vector<8x32xf32>
    %cst_50 = arith.constant dense<0.000000e+00> : vector<8x96xf32>
    %294 = tpu.matmul %293, %10, %cst_50 {dimension_numbers = #tpu.dot_dimension_numbers<[1], [0], [0], [1], [0, 0, 1, 1], [], []>} : vector<8x32xf32>, vector<32x96xf32>, vector<8x96xf32> -> vector<8x96xf32>
    %295 = vector.broadcast %11 : vector<1x96xf32> to vector<8x96xf32>
    %296 = arith.addf %294, %295 : vector<8x96xf32>
    %297 = vector.extract_strided_slice %266 {offsets = [0, 96], sizes = [8, 96], strides = [1, 1]} : vector<8x192xf32> to vector<8x96xf32>
    %298 = vector.extract_strided_slice %296 {offsets = [0, 0], sizes = [8, 32], strides = [1, 1]} : vector<8x96xf32> to vector<8x32xf32>
    %299 = vector.extract_strided_slice %297 {offsets = [0, 0], sizes = [8, 32], strides = [1, 1]} : vector<8x96xf32> to vector<8x32xf32>
    %300 = arith.addf %298, %299 : vector<8x32xf32>
    %301 = arith.negf %300 : vector<8x32xf32>
    %302 = math.exp %301 : vector<8x32xf32>
    %cst_51 = arith.constant 1.000000e+00 : f32
    %303 = vector.broadcast %cst_51 : f32 to vector<8x32xf32>
    %304 = arith.addf %303, %302 : vector<8x32xf32>
    %305 = arith.divf %303, %304 : vector<8x32xf32>
    %306 = vector.extract_strided_slice %296 {offsets = [0, 32], sizes = [8, 32], strides = [1, 1]} : vector<8x96xf32> to vector<8x32xf32>
    %307 = vector.extract_strided_slice %297 {offsets = [0, 32], sizes = [8, 32], strides = [1, 1]} : vector<8x96xf32> to vector<8x32xf32>
    %308 = arith.addf %306, %307 : vector<8x32xf32>
    %309 = arith.negf %308 : vector<8x32xf32>
    %310 = math.exp %309 : vector<8x32xf32>
    %cst_52 = arith.constant 1.000000e+00 : f32
    %311 = vector.broadcast %cst_52 : f32 to vector<8x32xf32>
    %312 = arith.addf %311, %310 : vector<8x32xf32>
    %313 = arith.divf %311, %312 : vector<8x32xf32>
    %314 = vector.extract_strided_slice %296 {offsets = [0, 64], sizes = [8, 32], strides = [1, 1]} : vector<8x96xf32> to vector<8x32xf32>
    %315 = vector.extract_strided_slice %297 {offsets = [0, 64], sizes = [8, 32], strides = [1, 1]} : vector<8x96xf32> to vector<8x32xf32>
    %316 = arith.mulf %305, %315 : vector<8x32xf32>
    %317 = arith.addf %314, %316 : vector<8x32xf32>
    %318 = math.tanh %317 : vector<8x32xf32>
    %cst_53 = arith.constant 1.000000e+00 : f32
    %319 = vector.broadcast %cst_53 : f32 to vector<8x32xf32>
    %320 = arith.subf %319, %313 : vector<8x32xf32>
    %321 = arith.mulf %320, %318 : vector<8x32xf32>
    %322 = arith.mulf %313, %261 : vector<8x32xf32>
    %323 = arith.addf %321, %322 : vector<8x32xf32>
    %324 = vector.extract_strided_slice %7 {offsets = [40, 0], sizes = [8, 96], strides = [1, 1]} : vector<64x96xf32> to vector<8x96xf32>
    %325 = tpu.concatenate %293, %323 in 1 : vector<8x32xf32>, vector<8x32xf32> -> vector<8x64xf32>
    %cst_54 = arith.constant dense<0.000000e+00> : vector<8x192xf32>
    %326 = tpu.matmul %325, %8, %cst_54 {dimension_numbers = #tpu.dot_dimension_numbers<[1], [0], [0], [1], [0, 0, 1, 1], [], []>} : vector<8x64xf32>, vector<64x192xf32>, vector<8x192xf32> -> vector<8x192xf32>
    %327 = vector.broadcast %9 : vector<1x192xf32> to vector<8x192xf32>
    %328 = arith.addf %326, %327 : vector<8x192xf32>
    %329 = vector.extract_strided_slice %328 {offsets = [0, 0], sizes = [8, 96], strides = [1, 1]} : vector<8x192xf32> to vector<8x96xf32>
    %330 = vector.extract_strided_slice %324 {offsets = [0, 0], sizes = [8, 32], strides = [1, 1]} : vector<8x96xf32> to vector<8x32xf32>
    %331 = vector.extract_strided_slice %329 {offsets = [0, 0], sizes = [8, 32], strides = [1, 1]} : vector<8x96xf32> to vector<8x32xf32>
    %332 = arith.addf %330, %331 : vector<8x32xf32>
    %333 = arith.negf %332 : vector<8x32xf32>
    %334 = math.exp %333 : vector<8x32xf32>
    %cst_55 = arith.constant 1.000000e+00 : f32
    %335 = vector.broadcast %cst_55 : f32 to vector<8x32xf32>
    %336 = arith.addf %335, %334 : vector<8x32xf32>
    %337 = arith.divf %335, %336 : vector<8x32xf32>
    %338 = vector.extract_strided_slice %324 {offsets = [0, 32], sizes = [8, 32], strides = [1, 1]} : vector<8x96xf32> to vector<8x32xf32>
    %339 = vector.extract_strided_slice %329 {offsets = [0, 32], sizes = [8, 32], strides = [1, 1]} : vector<8x96xf32> to vector<8x32xf32>
    %340 = arith.addf %338, %339 : vector<8x32xf32>
    %341 = arith.negf %340 : vector<8x32xf32>
    %342 = math.exp %341 : vector<8x32xf32>
    %cst_56 = arith.constant 1.000000e+00 : f32
    %343 = vector.broadcast %cst_56 : f32 to vector<8x32xf32>
    %344 = arith.addf %343, %342 : vector<8x32xf32>
    %345 = arith.divf %343, %344 : vector<8x32xf32>
    %346 = vector.extract_strided_slice %324 {offsets = [0, 64], sizes = [8, 32], strides = [1, 1]} : vector<8x96xf32> to vector<8x32xf32>
    %347 = vector.extract_strided_slice %329 {offsets = [0, 64], sizes = [8, 32], strides = [1, 1]} : vector<8x96xf32> to vector<8x32xf32>
    %348 = arith.mulf %337, %347 : vector<8x32xf32>
    %349 = arith.addf %346, %348 : vector<8x32xf32>
    %350 = math.tanh %349 : vector<8x32xf32>
    %cst_57 = arith.constant 1.000000e+00 : f32
    %351 = vector.broadcast %cst_57 : f32 to vector<8x32xf32>
    %352 = arith.subf %351, %345 : vector<8x32xf32>
    %353 = arith.mulf %352, %350 : vector<8x32xf32>
    %354 = arith.mulf %345, %293 : vector<8x32xf32>
    %355 = arith.addf %353, %354 : vector<8x32xf32>
    %cst_58 = arith.constant dense<0.000000e+00> : vector<8x96xf32>
    %356 = tpu.matmul %355, %10, %cst_58 {dimension_numbers = #tpu.dot_dimension_numbers<[1], [0], [0], [1], [0, 0, 1, 1], [], []>} : vector<8x32xf32>, vector<32x96xf32>, vector<8x96xf32> -> vector<8x96xf32>
    %357 = vector.broadcast %11 : vector<1x96xf32> to vector<8x96xf32>
    %358 = arith.addf %356, %357 : vector<8x96xf32>
    %359 = vector.extract_strided_slice %328 {offsets = [0, 96], sizes = [8, 96], strides = [1, 1]} : vector<8x192xf32> to vector<8x96xf32>
    %360 = vector.extract_strided_slice %358 {offsets = [0, 0], sizes = [8, 32], strides = [1, 1]} : vector<8x96xf32> to vector<8x32xf32>
    %361 = vector.extract_strided_slice %359 {offsets = [0, 0], sizes = [8, 32], strides = [1, 1]} : vector<8x96xf32> to vector<8x32xf32>
    %362 = arith.addf %360, %361 : vector<8x32xf32>
    %363 = arith.negf %362 : vector<8x32xf32>
    %364 = math.exp %363 : vector<8x32xf32>
    %cst_59 = arith.constant 1.000000e+00 : f32
    %365 = vector.broadcast %cst_59 : f32 to vector<8x32xf32>
    %366 = arith.addf %365, %364 : vector<8x32xf32>
    %367 = arith.divf %365, %366 : vector<8x32xf32>
    %368 = vector.extract_strided_slice %358 {offsets = [0, 32], sizes = [8, 32], strides = [1, 1]} : vector<8x96xf32> to vector<8x32xf32>
    %369 = vector.extract_strided_slice %359 {offsets = [0, 32], sizes = [8, 32], strides = [1, 1]} : vector<8x96xf32> to vector<8x32xf32>
    %370 = arith.addf %368, %369 : vector<8x32xf32>
    %371 = arith.negf %370 : vector<8x32xf32>
    %372 = math.exp %371 : vector<8x32xf32>
    %cst_60 = arith.constant 1.000000e+00 : f32
    %373 = vector.broadcast %cst_60 : f32 to vector<8x32xf32>
    %374 = arith.addf %373, %372 : vector<8x32xf32>
    %375 = arith.divf %373, %374 : vector<8x32xf32>
    %376 = vector.extract_strided_slice %358 {offsets = [0, 64], sizes = [8, 32], strides = [1, 1]} : vector<8x96xf32> to vector<8x32xf32>
    %377 = vector.extract_strided_slice %359 {offsets = [0, 64], sizes = [8, 32], strides = [1, 1]} : vector<8x96xf32> to vector<8x32xf32>
    %378 = arith.mulf %367, %377 : vector<8x32xf32>
    %379 = arith.addf %376, %378 : vector<8x32xf32>
    %380 = math.tanh %379 : vector<8x32xf32>
    %cst_61 = arith.constant 1.000000e+00 : f32
    %381 = vector.broadcast %cst_61 : f32 to vector<8x32xf32>
    %382 = arith.subf %381, %375 : vector<8x32xf32>
    %383 = arith.mulf %382, %380 : vector<8x32xf32>
    %384 = arith.mulf %375, %323 : vector<8x32xf32>
    %385 = arith.addf %383, %384 : vector<8x32xf32>
    %386 = vector.extract_strided_slice %7 {offsets = [48, 0], sizes = [8, 96], strides = [1, 1]} : vector<64x96xf32> to vector<8x96xf32>
    %387 = tpu.concatenate %355, %385 in 1 : vector<8x32xf32>, vector<8x32xf32> -> vector<8x64xf32>
    %cst_62 = arith.constant dense<0.000000e+00> : vector<8x192xf32>
    %388 = tpu.matmul %387, %8, %cst_62 {dimension_numbers = #tpu.dot_dimension_numbers<[1], [0], [0], [1], [0, 0, 1, 1], [], []>} : vector<8x64xf32>, vector<64x192xf32>, vector<8x192xf32> -> vector<8x192xf32>
    %389 = vector.broadcast %9 : vector<1x192xf32> to vector<8x192xf32>
    %390 = arith.addf %388, %389 : vector<8x192xf32>
    %391 = vector.extract_strided_slice %390 {offsets = [0, 0], sizes = [8, 96], strides = [1, 1]} : vector<8x192xf32> to vector<8x96xf32>
    %392 = vector.extract_strided_slice %386 {offsets = [0, 0], sizes = [8, 32], strides = [1, 1]} : vector<8x96xf32> to vector<8x32xf32>
    %393 = vector.extract_strided_slice %391 {offsets = [0, 0], sizes = [8, 32], strides = [1, 1]} : vector<8x96xf32> to vector<8x32xf32>
    %394 = arith.addf %392, %393 : vector<8x32xf32>
    %395 = arith.negf %394 : vector<8x32xf32>
    %396 = math.exp %395 : vector<8x32xf32>
    %cst_63 = arith.constant 1.000000e+00 : f32
    %397 = vector.broadcast %cst_63 : f32 to vector<8x32xf32>
    %398 = arith.addf %397, %396 : vector<8x32xf32>
    %399 = arith.divf %397, %398 : vector<8x32xf32>
    %400 = vector.extract_strided_slice %386 {offsets = [0, 32], sizes = [8, 32], strides = [1, 1]} : vector<8x96xf32> to vector<8x32xf32>
    %401 = vector.extract_strided_slice %391 {offsets = [0, 32], sizes = [8, 32], strides = [1, 1]} : vector<8x96xf32> to vector<8x32xf32>
    %402 = arith.addf %400, %401 : vector<8x32xf32>
    %403 = arith.negf %402 : vector<8x32xf32>
    %404 = math.exp %403 : vector<8x32xf32>
    %cst_64 = arith.constant 1.000000e+00 : f32
    %405 = vector.broadcast %cst_64 : f32 to vector<8x32xf32>
    %406 = arith.addf %405, %404 : vector<8x32xf32>
    %407 = arith.divf %405, %406 : vector<8x32xf32>
    %408 = vector.extract_strided_slice %386 {offsets = [0, 64], sizes = [8, 32], strides = [1, 1]} : vector<8x96xf32> to vector<8x32xf32>
    %409 = vector.extract_strided_slice %391 {offsets = [0, 64], sizes = [8, 32], strides = [1, 1]} : vector<8x96xf32> to vector<8x32xf32>
    %410 = arith.mulf %399, %409 : vector<8x32xf32>
    %411 = arith.addf %408, %410 : vector<8x32xf32>
    %412 = math.tanh %411 : vector<8x32xf32>
    %cst_65 = arith.constant 1.000000e+00 : f32
    %413 = vector.broadcast %cst_65 : f32 to vector<8x32xf32>
    %414 = arith.subf %413, %407 : vector<8x32xf32>
    %415 = arith.mulf %414, %412 : vector<8x32xf32>
    %416 = arith.mulf %407, %355 : vector<8x32xf32>
    %417 = arith.addf %415, %416 : vector<8x32xf32>
    %cst_66 = arith.constant dense<0.000000e+00> : vector<8x96xf32>
    %418 = tpu.matmul %417, %10, %cst_66 {dimension_numbers = #tpu.dot_dimension_numbers<[1], [0], [0], [1], [0, 0, 1, 1], [], []>} : vector<8x32xf32>, vector<32x96xf32>, vector<8x96xf32> -> vector<8x96xf32>
    %419 = vector.broadcast %11 : vector<1x96xf32> to vector<8x96xf32>
    %420 = arith.addf %418, %419 : vector<8x96xf32>
    %421 = vector.extract_strided_slice %390 {offsets = [0, 96], sizes = [8, 96], strides = [1, 1]} : vector<8x192xf32> to vector<8x96xf32>
    %422 = vector.extract_strided_slice %420 {offsets = [0, 0], sizes = [8, 32], strides = [1, 1]} : vector<8x96xf32> to vector<8x32xf32>
    %423 = vector.extract_strided_slice %421 {offsets = [0, 0], sizes = [8, 32], strides = [1, 1]} : vector<8x96xf32> to vector<8x32xf32>
    %424 = arith.addf %422, %423 : vector<8x32xf32>
    %425 = arith.negf %424 : vector<8x32xf32>
    %426 = math.exp %425 : vector<8x32xf32>
    %cst_67 = arith.constant 1.000000e+00 : f32
    %427 = vector.broadcast %cst_67 : f32 to vector<8x32xf32>
    %428 = arith.addf %427, %426 : vector<8x32xf32>
    %429 = arith.divf %427, %428 : vector<8x32xf32>
    %430 = vector.extract_strided_slice %420 {offsets = [0, 32], sizes = [8, 32], strides = [1, 1]} : vector<8x96xf32> to vector<8x32xf32>
    %431 = vector.extract_strided_slice %421 {offsets = [0, 32], sizes = [8, 32], strides = [1, 1]} : vector<8x96xf32> to vector<8x32xf32>
    %432 = arith.addf %430, %431 : vector<8x32xf32>
    %433 = arith.negf %432 : vector<8x32xf32>
    %434 = math.exp %433 : vector<8x32xf32>
    %cst_68 = arith.constant 1.000000e+00 : f32
    %435 = vector.broadcast %cst_68 : f32 to vector<8x32xf32>
    %436 = arith.addf %435, %434 : vector<8x32xf32>
    %437 = arith.divf %435, %436 : vector<8x32xf32>
    %438 = vector.extract_strided_slice %420 {offsets = [0, 64], sizes = [8, 32], strides = [1, 1]} : vector<8x96xf32> to vector<8x32xf32>
    %439 = vector.extract_strided_slice %421 {offsets = [0, 64], sizes = [8, 32], strides = [1, 1]} : vector<8x96xf32> to vector<8x32xf32>
    %440 = arith.mulf %429, %439 : vector<8x32xf32>
    %441 = arith.addf %438, %440 : vector<8x32xf32>
    %442 = math.tanh %441 : vector<8x32xf32>
    %cst_69 = arith.constant 1.000000e+00 : f32
    %443 = vector.broadcast %cst_69 : f32 to vector<8x32xf32>
    %444 = arith.subf %443, %437 : vector<8x32xf32>
    %445 = arith.mulf %444, %442 : vector<8x32xf32>
    %446 = arith.mulf %437, %385 : vector<8x32xf32>
    %447 = arith.addf %445, %446 : vector<8x32xf32>
    %448 = vector.extract_strided_slice %7 {offsets = [56, 0], sizes = [8, 96], strides = [1, 1]} : vector<64x96xf32> to vector<8x96xf32>
    %449 = tpu.concatenate %417, %447 in 1 : vector<8x32xf32>, vector<8x32xf32> -> vector<8x64xf32>
    %cst_70 = arith.constant dense<0.000000e+00> : vector<8x192xf32>
    %450 = tpu.matmul %449, %8, %cst_70 {dimension_numbers = #tpu.dot_dimension_numbers<[1], [0], [0], [1], [0, 0, 1, 1], [], []>} : vector<8x64xf32>, vector<64x192xf32>, vector<8x192xf32> -> vector<8x192xf32>
    %451 = vector.broadcast %9 : vector<1x192xf32> to vector<8x192xf32>
    %452 = arith.addf %450, %451 : vector<8x192xf32>
    %453 = vector.extract_strided_slice %452 {offsets = [0, 0], sizes = [8, 96], strides = [1, 1]} : vector<8x192xf32> to vector<8x96xf32>
    %454 = vector.extract_strided_slice %448 {offsets = [0, 0], sizes = [8, 32], strides = [1, 1]} : vector<8x96xf32> to vector<8x32xf32>
    %455 = vector.extract_strided_slice %453 {offsets = [0, 0], sizes = [8, 32], strides = [1, 1]} : vector<8x96xf32> to vector<8x32xf32>
    %456 = arith.addf %454, %455 : vector<8x32xf32>
    %457 = arith.negf %456 : vector<8x32xf32>
    %458 = math.exp %457 : vector<8x32xf32>
    %cst_71 = arith.constant 1.000000e+00 : f32
    %459 = vector.broadcast %cst_71 : f32 to vector<8x32xf32>
    %460 = arith.addf %459, %458 : vector<8x32xf32>
    %461 = arith.divf %459, %460 : vector<8x32xf32>
    %462 = vector.extract_strided_slice %448 {offsets = [0, 32], sizes = [8, 32], strides = [1, 1]} : vector<8x96xf32> to vector<8x32xf32>
    %463 = vector.extract_strided_slice %453 {offsets = [0, 32], sizes = [8, 32], strides = [1, 1]} : vector<8x96xf32> to vector<8x32xf32>
    %464 = arith.addf %462, %463 : vector<8x32xf32>
    %465 = arith.negf %464 : vector<8x32xf32>
    %466 = math.exp %465 : vector<8x32xf32>
    %cst_72 = arith.constant 1.000000e+00 : f32
    %467 = vector.broadcast %cst_72 : f32 to vector<8x32xf32>
    %468 = arith.addf %467, %466 : vector<8x32xf32>
    %469 = arith.divf %467, %468 : vector<8x32xf32>
    %470 = vector.extract_strided_slice %448 {offsets = [0, 64], sizes = [8, 32], strides = [1, 1]} : vector<8x96xf32> to vector<8x32xf32>
    %471 = vector.extract_strided_slice %453 {offsets = [0, 64], sizes = [8, 32], strides = [1, 1]} : vector<8x96xf32> to vector<8x32xf32>
    %472 = arith.mulf %461, %471 : vector<8x32xf32>
    %473 = arith.addf %470, %472 : vector<8x32xf32>
    %474 = math.tanh %473 : vector<8x32xf32>
    %cst_73 = arith.constant 1.000000e+00 : f32
    %475 = vector.broadcast %cst_73 : f32 to vector<8x32xf32>
    %476 = arith.subf %475, %469 : vector<8x32xf32>
    %477 = arith.mulf %476, %474 : vector<8x32xf32>
    %478 = arith.mulf %469, %417 : vector<8x32xf32>
    %479 = arith.addf %477, %478 : vector<8x32xf32>
    %cst_74 = arith.constant dense<0.000000e+00> : vector<8x96xf32>
    %480 = tpu.matmul %479, %10, %cst_74 {dimension_numbers = #tpu.dot_dimension_numbers<[1], [0], [0], [1], [0, 0, 1, 1], [], []>} : vector<8x32xf32>, vector<32x96xf32>, vector<8x96xf32> -> vector<8x96xf32>
    %481 = vector.broadcast %11 : vector<1x96xf32> to vector<8x96xf32>
    %482 = arith.addf %480, %481 : vector<8x96xf32>
    %483 = vector.extract_strided_slice %452 {offsets = [0, 96], sizes = [8, 96], strides = [1, 1]} : vector<8x192xf32> to vector<8x96xf32>
    %484 = vector.extract_strided_slice %482 {offsets = [0, 0], sizes = [8, 32], strides = [1, 1]} : vector<8x96xf32> to vector<8x32xf32>
    %485 = vector.extract_strided_slice %483 {offsets = [0, 0], sizes = [8, 32], strides = [1, 1]} : vector<8x96xf32> to vector<8x32xf32>
    %486 = arith.addf %484, %485 : vector<8x32xf32>
    %487 = arith.negf %486 : vector<8x32xf32>
    %488 = math.exp %487 : vector<8x32xf32>
    %cst_75 = arith.constant 1.000000e+00 : f32
    %489 = vector.broadcast %cst_75 : f32 to vector<8x32xf32>
    %490 = arith.addf %489, %488 : vector<8x32xf32>
    %491 = arith.divf %489, %490 : vector<8x32xf32>
    %492 = vector.extract_strided_slice %482 {offsets = [0, 32], sizes = [8, 32], strides = [1, 1]} : vector<8x96xf32> to vector<8x32xf32>
    %493 = vector.extract_strided_slice %483 {offsets = [0, 32], sizes = [8, 32], strides = [1, 1]} : vector<8x96xf32> to vector<8x32xf32>
    %494 = arith.addf %492, %493 : vector<8x32xf32>
    %495 = arith.negf %494 : vector<8x32xf32>
    %496 = math.exp %495 : vector<8x32xf32>
    %cst_76 = arith.constant 1.000000e+00 : f32
    %497 = vector.broadcast %cst_76 : f32 to vector<8x32xf32>
    %498 = arith.addf %497, %496 : vector<8x32xf32>
    %499 = arith.divf %497, %498 : vector<8x32xf32>
    %500 = vector.extract_strided_slice %482 {offsets = [0, 64], sizes = [8, 32], strides = [1, 1]} : vector<8x96xf32> to vector<8x32xf32>
    %501 = vector.extract_strided_slice %483 {offsets = [0, 64], sizes = [8, 32], strides = [1, 1]} : vector<8x96xf32> to vector<8x32xf32>
    %502 = arith.mulf %491, %501 : vector<8x32xf32>
    %503 = arith.addf %500, %502 : vector<8x32xf32>
    %504 = math.tanh %503 : vector<8x32xf32>
    %cst_77 = arith.constant 1.000000e+00 : f32
    %505 = vector.broadcast %cst_77 : f32 to vector<8x32xf32>
    %506 = arith.subf %505, %499 : vector<8x32xf32>
    %507 = arith.mulf %506, %504 : vector<8x32xf32>
    %508 = arith.mulf %499, %447 : vector<8x32xf32>
    %509 = arith.addf %507, %508 : vector<8x32xf32>
    %c0_78 = arith.constant 0 : index
    %c0_79 = arith.constant 0 : index
    %510 = vector.load %arg8[%c0_78, %c0_79] : memref<32x18xf32, #tpu.memory_space<vmem>>, vector<32x18xf32>
    %cst_80 = arith.constant dense<0.000000e+00> : vector<8x18xf32>
    %511 = tpu.matmul %509, %510, %cst_80 {dimension_numbers = #tpu.dot_dimension_numbers<[1], [0], [0], [1], [0, 0, 1, 1], [], []>} : vector<8x32xf32>, vector<32x18xf32>, vector<8x18xf32> -> vector<8x18xf32>
    %c0_81 = arith.constant 0 : index
    %c0_82 = arith.constant 0 : index
    %512 = vector.load %arg9[%c0_81, %c0_82] : memref<1x18xf32, #tpu.memory_space<vmem>>, vector<1x18xf32>
    %513 = vector.broadcast %512 : vector<1x18xf32> to vector<8x18xf32>
    %514 = arith.addf %511, %513 : vector<8x18xf32>
    %515 = vector.extract_strided_slice %514 {offsets = [0, 0], sizes = [8, 1], strides = [1, 1]} : vector<8x18xf32> to vector<8x1xf32>
    %516 = vector.extract_strided_slice %514 {offsets = [0, 1], sizes = [8, 1], strides = [1, 1]} : vector<8x18xf32> to vector<8x1xf32>
    %517 = vector.extract_strided_slice %514 {offsets = [0, 2], sizes = [8, 16], strides = [1, 1]} : vector<8x18xf32> to vector<8x16xf32>
    %c0_83 = arith.constant 0 : index
    %c0_84 = arith.constant 0 : index
    %518 = vector.load %arg1[%c0_83, %c0_84] : memref<8x1xf32, #tpu.memory_space<vmem>>, vector<8x1xf32>
    %519 = arith.subf %518, %515 : vector<8x1xf32>
    %cst_85 = arith.constant -5.000000e-01 : f32
    %520 = vector.broadcast %cst_85 : f32 to vector<8x1xf32>
    %521 = arith.mulf %520, %516 : vector<8x1xf32>
    %522 = math.exp %521 : vector<8x1xf32>
    %523 = arith.mulf %519, %522 : vector<8x1xf32>
    %524 = vector.extract_strided_slice %517 {offsets = [0, 0], sizes = [4, 16], strides = [1, 1]} : vector<8x16xf32> to vector<4x16xf32>
    %525 = vector.extract_strided_slice %523 {offsets = [0, 0], sizes = [4, 1], strides = [1, 1]} : vector<8x1xf32> to vector<4x1xf32>
    %526 = arith.mulf %524, %524 : vector<4x16xf32>
    %cst_86 = arith.constant dense<0.000000e+00> : vector<4xf32>
    %527 = vector.multi_reduction <add>, %526, %cst_86 [1] : vector<4x16xf32> to vector<4xf32>
    %528 = vector.shape_cast %527 : vector<4xf32> to vector<4x1xf32>
    %529 = vector.broadcast %525 : vector<4x1xf32> to vector<4x16xf32>
    %530 = arith.mulf %524, %529 : vector<4x16xf32>
    %cst_87 = arith.constant dense<0.000000e+00> : vector<16xf32>
    %531 = vector.multi_reduction <add>, %530, %cst_87 [0] : vector<4x16xf32> to vector<16xf32>
    %532 = vector.shape_cast %531 : vector<16xf32> to vector<1x16xf32>
    %cst_88 = arith.constant dense<0.000000e+00> : vector<16xf32>
    %533 = vector.multi_reduction <add>, %524, %cst_88 [0] : vector<4x16xf32> to vector<16xf32>
    %534 = vector.shape_cast %533 : vector<16xf32> to vector<1x16xf32>
    %535 = vector.broadcast %532 : vector<1x16xf32> to vector<4x16xf32>
    %536 = arith.mulf %524, %535 : vector<4x16xf32>
    %cst_89 = arith.constant dense<0.000000e+00> : vector<4xf32>
    %537 = vector.multi_reduction <add>, %536, %cst_89 [1] : vector<4x16xf32> to vector<4xf32>
    %538 = vector.shape_cast %537 : vector<4xf32> to vector<4x1xf32>
    %539 = arith.mulf %525, %528 : vector<4x1xf32>
    %540 = arith.subf %538, %539 : vector<4x1xf32>
    %541 = vector.broadcast %534 : vector<1x16xf32> to vector<4x16xf32>
    %542 = arith.mulf %524, %541 : vector<4x16xf32>
    %cst_90 = arith.constant dense<0.000000e+00> : vector<4xf32>
    %543 = vector.multi_reduction <add>, %542, %cst_90 [1] : vector<4x16xf32> to vector<4xf32>
    %544 = vector.shape_cast %543 : vector<4xf32> to vector<4x1xf32>
    %545 = arith.subf %544, %528 : vector<4x1xf32>
    %546 = vector.shape_cast %525 : vector<4x1xf32> to vector<1x4x1xf32>
    %cst_91 = arith.constant dense<0.000000e+00> : vector<1xf32>
    %547 = vector.multi_reduction <add>, %546, %cst_91 [1, 2] : vector<1x4x1xf32> to vector<1xf32>
    %548 = vector.shape_cast %547 : vector<1xf32> to vector<1x1x1xf32>
    %549 = vector.extract %548[0, 0, 0] : f32 from vector<1x1x1xf32>
    %550 = vector.broadcast %549 : f32 to vector<1x1xf32>
    %551 = arith.mulf %525, %525 : vector<4x1xf32>
    %552 = vector.shape_cast %551 : vector<4x1xf32> to vector<1x4x1xf32>
    %cst_92 = arith.constant dense<0.000000e+00> : vector<1xf32>
    %553 = vector.multi_reduction <add>, %552, %cst_92 [1, 2] : vector<1x4x1xf32> to vector<1xf32>
    %554 = vector.shape_cast %553 : vector<1xf32> to vector<1x1x1xf32>
    %555 = vector.extract %554[0, 0, 0] : f32 from vector<1x1x1xf32>
    %556 = vector.broadcast %555 : f32 to vector<1x1xf32>
    %557 = vector.broadcast %550 : vector<1x1xf32> to vector<4x1xf32>
    %558 = arith.subf %557, %525 : vector<4x1xf32>
    %cst_93 = arith.constant 3.000000e+00 : f32
    %559 = vector.broadcast %cst_93 : f32 to vector<4x1xf32>
    %560 = arith.divf %558, %559 : vector<4x1xf32>
    %561 = arith.mulf %525, %525 : vector<4x1xf32>
    %562 = vector.broadcast %556 : vector<1x1xf32> to vector<4x1xf32>
    %563 = arith.subf %562, %561 : vector<4x1xf32>
    %cst_94 = arith.constant 3.000000e+00 : f32
    %564 = vector.broadcast %cst_94 : f32 to vector<4x1xf32>
    %565 = arith.mulf %564, %560 : vector<4x1xf32>
    %566 = arith.mulf %565, %560 : vector<4x1xf32>
    %567 = arith.subf %563, %566 : vector<4x1xf32>
    %cst_95 = arith.constant 2.000000e+00 : f32
    %568 = vector.broadcast %cst_95 : f32 to vector<4x1xf32>
    %569 = arith.divf %567, %568 : vector<4x1xf32>
    %cst_96 = arith.constant 0.000000e+00 : f32
    %570 = vector.broadcast %cst_96 : f32 to vector<4x1xf32>
    %571 = arith.maximumf %569, %570 : vector<4x1xf32>
    %572 = math.sqrt %571 : vector<4x1xf32>
    %573 = vector.extract_strided_slice %515 {offsets = [0, 0], sizes = [4, 1], strides = [1, 1]} : vector<8x1xf32> to vector<4x1xf32>
    %574 = vector.extract_strided_slice %516 {offsets = [0, 0], sizes = [4, 1], strides = [1, 1]} : vector<8x1xf32> to vector<4x1xf32>
    %575 = tpu.concatenate %573, %574, %540, %545, %572 in 1 : vector<4x1xf32>, vector<4x1xf32>, vector<4x1xf32>, vector<4x1xf32>, vector<4x1xf32> -> vector<4x5xf32>
    %576 = vector.extract_strided_slice %517 {offsets = [4, 0], sizes = [4, 16], strides = [1, 1]} : vector<8x16xf32> to vector<4x16xf32>
    %577 = vector.extract_strided_slice %523 {offsets = [4, 0], sizes = [4, 1], strides = [1, 1]} : vector<8x1xf32> to vector<4x1xf32>
    %578 = arith.mulf %576, %576 : vector<4x16xf32>
    %cst_97 = arith.constant dense<0.000000e+00> : vector<4xf32>
    %579 = vector.multi_reduction <add>, %578, %cst_97 [1] : vector<4x16xf32> to vector<4xf32>
    %580 = vector.shape_cast %579 : vector<4xf32> to vector<4x1xf32>
    %581 = vector.broadcast %577 : vector<4x1xf32> to vector<4x16xf32>
    %582 = arith.mulf %576, %581 : vector<4x16xf32>
    %cst_98 = arith.constant dense<0.000000e+00> : vector<16xf32>
    %583 = vector.multi_reduction <add>, %582, %cst_98 [0] : vector<4x16xf32> to vector<16xf32>
    %584 = vector.shape_cast %583 : vector<16xf32> to vector<1x16xf32>
    %cst_99 = arith.constant dense<0.000000e+00> : vector<16xf32>
    %585 = vector.multi_reduction <add>, %576, %cst_99 [0] : vector<4x16xf32> to vector<16xf32>
    %586 = vector.shape_cast %585 : vector<16xf32> to vector<1x16xf32>
    %587 = vector.broadcast %584 : vector<1x16xf32> to vector<4x16xf32>
    %588 = arith.mulf %576, %587 : vector<4x16xf32>
    %cst_100 = arith.constant dense<0.000000e+00> : vector<4xf32>
    %589 = vector.multi_reduction <add>, %588, %cst_100 [1] : vector<4x16xf32> to vector<4xf32>
    %590 = vector.shape_cast %589 : vector<4xf32> to vector<4x1xf32>
    %591 = arith.mulf %577, %580 : vector<4x1xf32>
    %592 = arith.subf %590, %591 : vector<4x1xf32>
    %593 = vector.broadcast %586 : vector<1x16xf32> to vector<4x16xf32>
    %594 = arith.mulf %576, %593 : vector<4x16xf32>
    %cst_101 = arith.constant dense<0.000000e+00> : vector<4xf32>
    %595 = vector.multi_reduction <add>, %594, %cst_101 [1] : vector<4x16xf32> to vector<4xf32>
    %596 = vector.shape_cast %595 : vector<4xf32> to vector<4x1xf32>
    %597 = arith.subf %596, %580 : vector<4x1xf32>
    %598 = vector.shape_cast %577 : vector<4x1xf32> to vector<1x4x1xf32>
    %cst_102 = arith.constant dense<0.000000e+00> : vector<1xf32>
    %599 = vector.multi_reduction <add>, %598, %cst_102 [1, 2] : vector<1x4x1xf32> to vector<1xf32>
    %600 = vector.shape_cast %599 : vector<1xf32> to vector<1x1x1xf32>
    %601 = vector.extract %600[0, 0, 0] : f32 from vector<1x1x1xf32>
    %602 = vector.broadcast %601 : f32 to vector<1x1xf32>
    %603 = arith.mulf %577, %577 : vector<4x1xf32>
    %604 = vector.shape_cast %603 : vector<4x1xf32> to vector<1x4x1xf32>
    %cst_103 = arith.constant dense<0.000000e+00> : vector<1xf32>
    %605 = vector.multi_reduction <add>, %604, %cst_103 [1, 2] : vector<1x4x1xf32> to vector<1xf32>
    %606 = vector.shape_cast %605 : vector<1xf32> to vector<1x1x1xf32>
    %607 = vector.extract %606[0, 0, 0] : f32 from vector<1x1x1xf32>
    %608 = vector.broadcast %607 : f32 to vector<1x1xf32>
    %609 = vector.broadcast %602 : vector<1x1xf32> to vector<4x1xf32>
    %610 = arith.subf %609, %577 : vector<4x1xf32>
    %cst_104 = arith.constant 3.000000e+00 : f32
    %611 = vector.broadcast %cst_104 : f32 to vector<4x1xf32>
    %612 = arith.divf %610, %611 : vector<4x1xf32>
    %613 = arith.mulf %577, %577 : vector<4x1xf32>
    %614 = vector.broadcast %608 : vector<1x1xf32> to vector<4x1xf32>
    %615 = arith.subf %614, %613 : vector<4x1xf32>
    %cst_105 = arith.constant 3.000000e+00 : f32
    %616 = vector.broadcast %cst_105 : f32 to vector<4x1xf32>
    %617 = arith.mulf %616, %612 : vector<4x1xf32>
    %618 = arith.mulf %617, %612 : vector<4x1xf32>
    %619 = arith.subf %615, %618 : vector<4x1xf32>
    %cst_106 = arith.constant 2.000000e+00 : f32
    %620 = vector.broadcast %cst_106 : f32 to vector<4x1xf32>
    %621 = arith.divf %619, %620 : vector<4x1xf32>
    %cst_107 = arith.constant 0.000000e+00 : f32
    %622 = vector.broadcast %cst_107 : f32 to vector<4x1xf32>
    %623 = arith.maximumf %621, %622 : vector<4x1xf32>
    %624 = math.sqrt %623 : vector<4x1xf32>
    %625 = vector.extract_strided_slice %515 {offsets = [4, 0], sizes = [4, 1], strides = [1, 1]} : vector<8x1xf32> to vector<4x1xf32>
    %626 = vector.extract_strided_slice %516 {offsets = [4, 0], sizes = [4, 1], strides = [1, 1]} : vector<8x1xf32> to vector<4x1xf32>
    %627 = tpu.concatenate %625, %626, %592, %597, %624 in 1 : vector<4x1xf32>, vector<4x1xf32>, vector<4x1xf32>, vector<4x1xf32>, vector<4x1xf32> -> vector<4x5xf32>
    %628 = tpu.concatenate %575, %627 in 0 : vector<4x5xf32>, vector<4x5xf32> -> vector<8x5xf32>
    %c0_108 = arith.constant 0 : index
    %c0_109 = arith.constant 0 : index
    %629 = vector.load %arg10[%c0_108, %c0_109] : memref<5x32xf32, #tpu.memory_space<vmem>>, vector<5x32xf32>
    %cst_110 = arith.constant dense<0.000000e+00> : vector<8x32xf32>
    %630 = tpu.matmul %628, %629, %cst_110 {dimension_numbers = #tpu.dot_dimension_numbers<[1], [0], [0], [1], [0, 0, 1, 1], [], []>} : vector<8x5xf32>, vector<5x32xf32>, vector<8x32xf32> -> vector<8x32xf32>
    %c0_111 = arith.constant 0 : index
    %c0_112 = arith.constant 0 : index
    %631 = vector.load %arg11[%c0_111, %c0_112] : memref<1x32xf32, #tpu.memory_space<vmem>>, vector<1x32xf32>
    %632 = vector.broadcast %631 : vector<1x32xf32> to vector<8x32xf32>
    %633 = arith.addf %630, %632 : vector<8x32xf32>
    %cst_113 = arith.constant 0.000000e+00 : f32
    %634 = vector.broadcast %cst_113 : f32 to vector<8x32xf32>
    %635 = arith.maximumf %633, %634 : vector<8x32xf32>
    %c0_114 = arith.constant 0 : index
    %c0_115 = arith.constant 0 : index
    %636 = vector.load %arg12[%c0_114, %c0_115] : memref<32x2xf32, #tpu.memory_space<vmem>>, vector<32x2xf32>
    %cst_116 = arith.constant dense<0.000000e+00> : vector<8x2xf32>
    %637 = tpu.matmul %635, %636, %cst_116 {dimension_numbers = #tpu.dot_dimension_numbers<[1], [0], [0], [1], [0, 0, 1, 1], [], []>} : vector<8x32xf32>, vector<32x2xf32>, vector<8x2xf32> -> vector<8x2xf32>
    %c0_117 = arith.constant 0 : index
    %c0_118 = arith.constant 0 : index
    %638 = vector.load %arg13[%c0_117, %c0_118] : memref<1x2xf32, #tpu.memory_space<vmem>>, vector<1x2xf32>
    %639 = vector.broadcast %638 : vector<1x2xf32> to vector<8x2xf32>
    %640 = arith.addf %637, %639 : vector<8x2xf32>
    %641 = vector.extract_strided_slice %640 {offsets = [0, 0], sizes = [8, 1], strides = [1, 1]} : vector<8x2xf32> to vector<8x1xf32>
    %642 = vector.extract_strided_slice %640 {offsets = [0, 1], sizes = [8, 1], strides = [1, 1]} : vector<8x2xf32> to vector<8x1xf32>
    %643 = arith.subf %518, %641 : vector<8x1xf32>
    %644 = arith.mulf %643, %643 : vector<8x1xf32>
    %cst_119 = arith.constant 0.000000e+00 : f32
    %645 = vector.broadcast %cst_119 : f32 to vector<8x1xf32>
    %646 = arith.subf %645, %642 : vector<8x1xf32>
    %647 = math.exp %646 : vector<8x1xf32>
    %648 = arith.mulf %644, %647 : vector<8x1xf32>
    %cst_120 = arith.constant 5.000000e-01 : f32
    %649 = vector.broadcast %cst_120 : f32 to vector<8x1xf32>
    %650 = arith.mulf %648, %649 : vector<8x1xf32>
    %651 = arith.addf %650, %642 : vector<8x1xf32>
    %652 = vector.shape_cast %651 : vector<8x1xf32> to vector<1x8x1xf32>
    %cst_121 = arith.constant dense<0.000000e+00> : vector<1xf32>
    %653 = vector.multi_reduction <add>, %652, %cst_121 [1, 2] : vector<1x8x1xf32> to vector<1xf32>
    %654 = vector.shape_cast %653 : vector<1xf32> to vector<1x1x1xf32>
    %655 = vector.extract %654[0, 0, 0] : f32 from vector<1x1x1xf32>
    %656 = vector.broadcast %655 : f32 to vector<1x1xf32>
    %c0_122 = arith.constant 0 : index
    %c0_123 = arith.constant 0 : index
    %657 = vector.load %arg14[%c0_122, %c0_123] : memref<1x1xf32, #tpu.memory_space<vmem>>, vector<1x1xf32>
    tpu.vector_store %arg14[%c0_122, %c0_123], %656 {strides = array<i32>} : memref<1x1xf32, #tpu.memory_space<vmem>>, vector<1x1xf32>,
    return
  }
}

</mosaic_0001>

<bundles_post_ra>
// kernel: forecast_forward.1
= control target key start
LH: loop header
LB: loop body
LE: loop exit
PB: predicated region body
PF: predicated region fallthrough
CT: control target
= control target key end

     0   :  { %v2825_v4 = vmov 0.0   ;;  %v2826_v6 = vmov 0   ;;  %s3682_s0 = inlined_call_operand.vmem [shape: f32[64,1], index: 0, kind: input, shape index: {}]   ;;  %s3683_s1 = inlined_call_operand.vmem [shape: f32[8,1], index: 1, kind: input, shape index: {}]   ;;  %s3684_s2 = inlined_call_operand.vmem [shape: f32[1,96], index: 2, kind: input, shape index: {}]   ;;  %s3685_s3 = inlined_call_operand.vmem [shape: f32[1,96], index: 3, kind: input, shape index: {}]   ;;  %s3686_s4 = inlined_call_operand.vmem [shape: f32[64,192], index: 4, kind: input, shape index: {}]   ;;  %s3687_s5 = inlined_call_operand.vmem [shape: f32[1,192], index: 5, kind: input, shape index: {}]   ;;  %s3688_s6 = inlined_call_operand.vmem [shape: f32[32,96], index: 6, kind: input, shape index: {}]   ;;  %s3689_s7 = inlined_call_operand.vmem [shape: f32[1,96], index: 7, kind: input, shape index: {}]   ;;  %s3690_s8 = inlined_call_operand.vmem [shape: f32[32,18], index: 8, kind: input, shape index: {}]   ;;  %s3691_s9 = inlined_call_operand.vmem [shape: f32[1,18], index: 9, kind: input, shape index: {}]   ;;  %s3692_s10 = inlined_call_operand.vmem [shape: f32[5,32], index: 10, kind: input, shape index: {}]   ;;  %s3693_s11 = inlined_call_operand.vmem [shape: f32[1,32], index: 11, kind: input, shape index: {}]   ;;  %s3694_s12 = inlined_call_operand.vmem [shape: f32[32,2], index: 12, kind: input, shape index: {}]   ;;  %s3695_s13 = inlined_call_operand.vmem [shape: f32[1,2], index: 13, kind: input, shape index: {}]   ;;  %s3696_s14 = inlined_call_operand.hbm [shape: f32[1,1], index: 14, kind: output, shape index: {}]  }
   0x1   :  { %v2914_v0 = vld [vmem:[%s3686_s4 + $0x78] sm:$0xff]  ;;  %v2919_v1 = vld [vmem:[%s3686_s4 + $0x70] sm:$0xff]  ;;  %v2924_v2 = vld [vmem:[%s3686_s4 + $0x68] sm:$0xff]  ;;  %227 = vmatprep.mubr.f32.mxu0 %v2825_v4  ;;  %2643 = vset.pattern.permute.xlu0 %v2826_v6 }
   0x2   :  { %179 = vmatprep.subr.mxu0 %v2914_v0  ;;  %v2930_v3 = vld [vmem:[%s3686_s4 + $0x60] sm:$0xff]  ;;  %v2937_v5 = vld [vmem:[%s3686_s4 + $0x58] sm:$0xff]  ;;  %v2943_v7 = vld [vmem:[%s3686_s4 + $0x50] sm:$0xff]  ;;  %2507 = vmatprep.subr.mxu1 %v2825_v4 }
   0x3   :  { %180 = vmatpush1.msra.mxu0 %v2919_v1  ;;  %v2950_v8 = vld [vmem:[%s3686_s4 + $0x48] sm:$0xff]  ;;  %v2956_v9 = vld [vmem:[%s3686_s4 + $0x40] sm:$0xff]  ;;  %v2965_v11 = vld [vmem:[%s3686_s4 + $0x38] sm:$0xff] }
   0x4   :  { %181 = vmatprep.subr.mxu0 %v2924_v2  ;;  %v48_v10 = vld [vmem:[%s3682_s0] sm:$0xff]  ;;  %v2971_v12 = vld [vmem:[%s3686_s4 + $0x30] sm:$0xff] }
   0x5   :  { %182 = vmatpush1.msra.mxu0 %v2930_v3  ;;  %59 = vperm.xlu0 %2643, %v48_v10  }
   0x6   :  { %183 = vmatprep.subr.mxu0 %v2937_v5 }
   0x7   :  { %184 = vmatpush1.msra.mxu0 %v2943_v7 }
   0x8   :  { %185 = vmatprep.subr.mxu0 %v2950_v8 }
   0x9   :  { %19 = vsyncpa [#allocation3], 0  ;;  %186 = vmatpush1.msra.mxu0 %v2956_v9  ;;  %v2977_v13 = vld [vmem:[%s3686_s4 + $0x28] sm:$0xff]  ;;  %v2983_v14 = vld [vmem:[%s3686_s4 + $0x20] sm:$0xff]  ;;  %v149_v19 = vlaneseq  ;;  %s2827_s17 = smov 64   ;;  %s2829_s26 = smov 32  }
   0xa   :  { %187 = vmatprep.subr.mxu0 %v2965_v11  ;;  %v2989_v15 = vld [vmem:[%s3686_s4 + $0x18] sm:$0xff]  ;;  %v2995_v16 = vld [vmem:[%s3686_s4 + $0x10] sm:$0xff]  ;;  %v3001_v17 = vld [vmem:[%s3686_s4 + $0x8] sm:$0xff]  ;;  %vm2830_vm0 = vmmov 0   ;;  %vm269_vm1 = vcmask 261120   ;;  %vm159_vm2 = vcmask 523264  }
   0xb   :  { %188 = vmatpush1.msra.mxu0 %v2971_v12  ;;  %v3007_v18 = vld [vmem:[%s3686_s4] sm:$0xff]  ;;  %v150_v20 = vshrl.u32 %v149_v19, 7  ;;  %v3038_v41 = vld [vmem:[%s3688_s6 + $0x18] sm:$0xff]  ;;  %v3043_v42 = vld [vmem:[%s3688_s6 + $0x10] sm:$0xff]  ;;  %2515 = vmatprep.mubr.msk.f32.mxu1 %vm2830_vm0, %v2825_v4  ;;  %s2831_s19 = smov 127   ;;  %vm2038_vm3 = vcmask 3072  }
   0xc   :  { %189 = vmatprep.subr.mxu0 %v2977_v13  ;;  %v142_v22 = vld [vmem:[%s3687_s5] sm:$0x3]  ;;  %s2828_s5 = smov 96   ;;  %2508 = vmatpush3.msra.mxu1 %v3038_v41  ;;  %v3051_v43 = vld [vmem:[%s3688_s6 + $0x8] sm:$0xff]  ;;  %vm2004_vm4 = vcmask 142352   ;;  %vm1994_vm5 = vcmask 125952  }
   0xd   :  { %190 = vmatpush1.msra.mxu0 %v2983_v14  ;;  %v151_v21 = vsub.s32 0, %v150_v20  ;;  %v3024_v26 = vld [vmem:[%s3684_s2] ss:$0 sm:$0xff]  ;;  %2509 = vmatprep.subr.mxu1 %v2825_v4  ;;  %v155_v45 = vsub.s32 1, %v150_v20  ;;  %v49_v54 = vld [vmem:[%s3682_s0 + $0x8] sm:$0xff]  ;;  %vm2093_vm6 = vcmask 130052  }
   0xe   :  { %191 = vmatprep.subr.mxu0 %v2989_v15  ;;  %v3030_v29 = vld [vmem:[%s3685_s3] ss:$0 sm:$0xff]  ;;  %2510 = vmatpush3.msra.mxu1 %v3043_v42  ;;  %vm2203_vm7 = vcmask 1044480   ;;  %s2833_s27 = smov 2   ;;  %s2834_s28 = smov 4   ;;  %vm2087_vm12 = vcmask 15360  }
   0xf   :  { %192 = vmatpush1.msra.mxu0 %v2995_v16  ;;  %v3017_v23 = vrot.slane %v142_v22, %v151_v21  ;;  %2511 = vmatprep.subr.mxu1 %v2825_v4  ;;  %v3061_v44 = vld [vmem:[%s3688_s6] sm:$0xff]  ;;  %v3076_v50 = vrot.slane %v142_v22, %v155_v45  ;;  %vm2089_vm13 = vcmask 23552   ;;  %vm2091_vm14 = vcmask 31744  }
  0x10   :  { %193 = vmatprep.subr.mxu0 %v3001_v17  ;;  %2512 = vmatpush3.msra.mxu1 %v3051_v43  ;;  %v3109_v56 = vld [vmem:[%s3689_s7] ss:$0 sm:$0xff]  ;;  %vm2189_vm15 = vcmask 1043456  }
  0x11   :  { %194 = vmatpush1.msra.mxu0 %v3007_v18  ;;  %2513 = vmatprep.subr.mxu1 %v2825_v4 }
  0x12   :  { %228 = vmatmul.mubr.f32.vlgmr.msra.gmra.mxu0 %v2825_v4  ;;  %2518 = vmatprep.subr.mxu0 %v2825_v4 }
  0x13   :  { %2519 = vmatpush3.msra.mxu0 %v3038_v41  ;;  %2514 = vmatpush3.msra.mxu1 %v3061_v44 }
  0x14   :  { %2520 = vmatprep.subr.mxu0 %v2825_v4  ;;  %402 = vmatprep.subr.mxu1 %v2914_v0 }
  0x15   :  { %2521 = vmatpush3.msra.mxu0 %v3043_v42  ;;  %2526 = vmatprep.mubr.msk.f32.mxu0 %vm2830_vm0, %v2825_v4 }
  0x16   :  { %2522 = vmatprep.subr.mxu0 %v2825_v4 }
  0x17   :  { %2523 = vmatpush3.msra.mxu0 %v3051_v43 }
  0x18   :  { %2524 = vmatprep.subr.mxu0 %v2825_v4 }
  0x19   :  { %2525 = vmatpush3.msra.mxu0 %v3061_v44 }
  0x1a   :  { %618 = vmatprep.subr.mxu0 %v2914_v0 }
  0x80   :  { %v60_v27 = vpop.permute.xlu0 %59 }
  0x81   :  { %v103_v28 = vmul.f32 %v3024_v26, %v60_v27 }
  0x83   :  { %v118_v30 = vadd.f32 %v3030_v29, %v103_v28 }
  0xd2   :  { %v229_v24 = vpop.f32.mrf.mxu0 }
  0xd3   :  { %v230_v25 = vadd.f32 %v229_v24, %v3017_v23 }
  0xd4   :  { %v231_v52 = vpop.f32.mrf.mxu0 }
  0xd5   :  { %242 = vrot.lane.b32.xlu0 %v230_v25, %s2827_s17  ;;  %v234_v31 = vadd.f32 %v230_v25, %v118_v30  ;;  %v232_v53 = vadd.f32 %v231_v52, %v3076_v50 }
  0xd7   :  { %v2408_v32 = vmul.f32 -1.442695, %v234_v31 }
  0xd9   :  { %2644 = vpow2.f32 %v2408_v32 }
  0xe6   :  { %v2645_v33 = vpop.eup %2644 }
  0xe7   :  { %v238_v34 = vadd.f32 1.0, %v2645_v33 }
  0xe9   :  { %2646 = vrcp.f32 %v238_v34 }
  0xf6   :  { %v2647_v35 = vpop.eup %2646 }
  0xf7   :  { %v252_v46 = vsub.f32 1.0, %v2647_v35  ;;  %v258_v48 = vmul.f32 0.0, %v2647_v35 }
 0x147   :  { %v243_v36 = vpop.permute.xlu0 %242 }
 0x148   :  { %v245_v37 = vmul.f32 %v2647_v35, %v243_v36 }
 0x14a   :  { %247 = vrot.lane.b32.xlu1 %v245_v37, %s2827_s17 }
 0x1bc   :  { %v248_v38 = vpop.permute.xlu1 %247 }
 0x1bd   :  { %v250_v39 = vadd.f32 %v248_v38, %v118_v30 }
 0x1bf   :  { %2648 = vtanh.f32 %v250_v39 }
 0x1cc   :  { %v2649_v40 = vpop.eup %2648 }
 0x1cd   :  { %254 = vrot.lane.b32.xlu1 %v2649_v40, %s2828_s5 }
 0x1d1   :  { %342 = vrot.lane.b32.xlu1 %v230_v25, %s2829_s26 }
 0x23f   :  { %v255_v47 = vpop.permute.xlu1 %254 }
 0x240   :  { %v257_v49 = vmul.f32 %v255_v47, %v252_v46 }
 0x242   :  { %v3078_v51 = vadd.f32 %v258_v48, %v257_v49 }
 0x243   :  { %v343_v59 = vpop.permute.xlu1 %342 }
 0x244   :  { %267 = vrot.lane.b32.xlu0 %v3078_v51, %s2828_s5 }
 0x248   :  { %363 = vrot.lane.b32.xlu0 %v232_v53, %s2828_s5 }
 0x24c   :  { %353 = vrot.lane.b32.xlu0 %v232_v53, %s2829_s26 }
 0x250   :  { %64 = vperm.xlu0 %2643, %v49_v54  }
 0x2b6   :  { %v268_v55 = vpop.permute.xlu0 %267 }
 0x2b7   :  { %2516 = vmatmul.mubr.msk.f32.vlgmr.msra.gmra.mxu1 %vm269_vm1, %v268_v55 }
 0x2b8   :  { %403 = vmatpush1.msra.mxu1 %v2919_v1  ;;  %450 = vmatprep.mubr.f32.mxu1 %v2825_v4 }
 0x2b9   :  { %404 = vmatprep.subr.mxu1 %v2924_v2 }
 0x2ba   :  { %405 = vmatpush1.msra.mxu1 %v2930_v3  ;;  %v364_v19 = vpop.permute.xlu0 %363 }
 0x2bb   :  { %406 = vmatprep.subr.mxu1 %v2937_v5 }
 0x2bc   :  { %407 = vmatpush1.msra.mxu1 %v2943_v7 }
 0x2bd   :  { %408 = vmatprep.subr.mxu1 %v2950_v8 }
 0x2be   :  { %409 = vmatpush1.msra.mxu1 %v2956_v9  ;;  %v354_v25 = vpop.permute.xlu0 %353 }
 0x2bf   :  { %410 = vmatprep.subr.mxu1 %v2965_v11 }
 0x2c0   :  { %411 = vmatpush1.msra.mxu1 %v2971_v12 }
 0x2c1   :  { %412 = vmatprep.subr.mxu1 %v2977_v13 }
 0x2c2   :  { %413 = vmatpush1.msra.mxu1 %v2983_v14 }
 0x2c3   :  { %414 = vmatprep.subr.mxu1 %v2989_v15 }
 0x2c4   :  { %415 = vmatpush1.msra.mxu1 %v2995_v16 }
 0x2c5   :  { %416 = vmatprep.subr.mxu1 %v3001_v17 }
 0x2c6   :  { %417 = vmatpush1.msra.mxu1 %v3007_v18 }
 0x2c7   :  { %2529 = vmatprep.subr.mxu1 %v2825_v4 }
 0x2cb   :  { %v65_v45 = vpop.permute.xlu0 %64 }
 0x2cc   :  { %v104_v46 = vmul.f32 %v3024_v26, %v65_v45 }
 0x2ce   :  { %v119_v47 = vadd.f32 %v3030_v29, %v104_v46 }
 0x377   :  { %v338_v57 = vpop.f32.mrf.mxu1 }
 0x378   :  { %v339_v58 = vadd.f32 %v3109_v56, %v338_v57 }
 0x379   :  { %v2517_v60 = vpop.f32.mrf.mxu1 }
 0x37a   :  { %v345_v61 = vadd.f32 %v343_v59, %v339_v58  ;;  %v356_v27 = vadd.f32 %v354_v25, %v339_v58 }
 0x37c   :  { %v2411_v62 = vmul.f32 -1.442695, %v345_v61  ;;  %v2412_v28 = vmul.f32 -1.442695, %v356_v27 }
 0x37e   :  { %2650 = vpow2.f32 %v2411_v62 }
 0x38b   :  { %v2651_v63 = vpop.eup %2650 }
 0x38c   :  { %v349_v6 = vadd.f32 1.0, %v2651_v63 }
 0x38e   :  { %2652 = vrcp.f32 %v349_v6 }
 0x39b   :  { %v2653_v10 = vpop.eup %2652 }
 0x39c   :  { %v366_v20 = vmul.f32 %v2653_v10, %v364_v19 }
 0x39e   :  { %368 = vrot.lane.b32.xlu1 %v366_v20, %s2827_s17 }
 0x410   :  { %v369_v21 = vpop.permute.xlu1 %368 }
 0x411   :  { %v371_v22 = vadd.f32 %v369_v21, %v339_v58  ;;  %v50_v21 = vld [vmem:[%s3682_s0 + $0x10] sm:$0xff] }
 0x413   :  { %2654 = vtanh.f32 %v371_v22 }
 0x414   :  { %2656 = vpow2.f32 %v2412_v28 }
 0x420   :  { %v2655_v24 = vpop.eup %2654 }
 0x421   :  { %375 = vrot.lane.b32.xlu1 %v2655_v24, %s2828_s5  ;;  %v2657_v30 = vpop.eup %2656 }
 0x422   :  { %v360_v31 = vadd.f32 1.0, %v2657_v30 }
 0x424   :  { %2658 = vrcp.f32 %v360_v31 }
 0x431   :  { %v2659_v32 = vpop.eup %2658 }
 0x432   :  { %v373_v33 = vsub.f32 1.0, %v2659_v32  ;;  %v379_v35 = vmul.f32 0.0, %v2659_v32 }
 0x493   :  { %v376_v34 = vpop.permute.xlu1 %375 }
 0x494   :  { %v378_v36 = vmul.f32 %v376_v34, %v373_v33 }
 0x496   :  { %v3114_v37 = vadd.f32 %v379_v35, %v378_v36 }
 0x498   :  { %v382_v38 = vsel %vm269_vm1, %v268_v55, %v3114_v37 }
 0x499   :  { %2413 = vmatmul.mubr.msk.f32.vlgmr.msra.gmra.mxu1 %vm159_vm2, %v382_v38 }
 0x49a   :  { %2530 = vmatpush3.msra.mxu1 %v3038_v41  ;;  %2537 = vmatprep.mubr.msk.f32.mxu1 %vm2830_vm0, %v2825_v4 }
 0x49b   :  { %2531 = vmatprep.subr.mxu1 %v2825_v4 }
 0x49c   :  { %2532 = vmatpush3.msra.mxu1 %v3043_v42 }
 0x49d   :  { %2533 = vmatprep.subr.mxu1 %v2825_v4 }
 0x49e   :  { %2534 = vmatpush3.msra.mxu1 %v3051_v43 }
 0x49f   :  { %2535 = vmatprep.subr.mxu1 %v2825_v4 }
 0x4a0   :  { %2536 = vmatpush3.msra.mxu1 %v3061_v44 }
 0x4a1   :  { %834 = vmatprep.subr.mxu1 %v2914_v0 }
 0x559   :  { %v452_v39 = vpop.f32.mrf.mxu1 }
 0x55a   :  { %v453_v40 = vadd.f32 %v452_v39, %v3017_v23 }
 0x55b   :  { %v454_v19 = vpop.f32.mrf.mxu1 }
 0x55c   :  { %465 = vrot.lane.b32.xlu1 %v453_v40, %s2827_s17  ;;  %v457_v48 = vadd.f32 %v453_v40, %v119_v47  ;;  %v455_v20 = vadd.f32 %v454_v19, %v3076_v50 }
 0x55e   :  { %v2414_v49 = vmul.f32 -1.442695, %v457_v48 }
 0x560   :  { %2660 = vpow2.f32 %v2414_v49 }
 0x56d   :  { %v2661_v52 = vpop.eup %2660 }
 0x56e   :  { %v461_v53 = vadd.f32 1.0, %v2661_v52 }
 0x570   :  { %2662 = vrcp.f32 %v461_v53 }
 0x57d   :  { %v2663_v54 = vpop.eup %2662 }
 0x57e   :  { %v475_v61 = vsub.f32 1.0, %v2663_v54  ;;  %v481_v63 = vmul.f32 %v2663_v54, %v3078_v51 }
 0x5ce   :  { %v466_v55 = vpop.permute.xlu1 %465 }
 0x5cf   :  { %v468_v57 = vmul.f32 %v2663_v54, %v466_v55 }
 0x5d1   :  { %470 = vrot.lane.b32.xlu0 %v468_v57, %s2827_s17 }
 0x643   :  { %v471_v58 = vpop.permute.xlu0 %470 }
 0x644   :  { %v473_v59 = vadd.f32 %v471_v58, %v119_v47 }
 0x646   :  { %2664 = vtanh.f32 %v473_v59 }
 0x653   :  { %v2665_v60 = vpop.eup %2664 }
 0x654   :  { %477 = vrot.lane.b32.xlu1 %v2665_v60, %s2828_s5 }
 0x658   :  { %558 = vrot.lane.b32.xlu1 %v453_v40, %s2829_s26 }
 0x6c6   :  { %v478_v62 = vpop.permute.xlu1 %477 }
 0x6c7   :  { %v480_v6 = vmul.f32 %v478_v62, %v475_v61 }
 0x6c9   :  { %v3137_v10 = vadd.f32 %v481_v63, %v480_v6 }
 0x6ca   :  { %v559_v25 = vpop.permute.xlu1 %558 }
 0x6cb   :  { %484 = vrot.lane.b32.xlu0 %v3137_v10, %s2828_s5 }
 0x6cf   :  { %579 = vrot.lane.b32.xlu0 %v455_v20, %s2828_s5 }
 0x6d3   :  { %569 = vrot.lane.b32.xlu0 %v455_v20, %s2829_s26 }
 0x6d7   :  { %69 = vperm.xlu0 %2643, %v50_v21  }
 0x73d   :  { %v485_v22 = vpop.permute.xlu0 %484 }
 0x73e   :  { %2527 = vmatmul.mubr.msk.f32.vlgmr.msra.gmra.mxu0 %vm269_vm1, %v485_v22 }
 0x73f   :  { %619 = vmatpush1.msra.mxu0 %v2919_v1  ;;  %666 = vmatprep.mubr.f32.mxu0 %v2825_v4 }
 0x740   :  { %620 = vmatprep.subr.mxu0 %v2924_v2 }
 0x741   :  { %621 = vmatpush1.msra.mxu0 %v2930_v3  ;;  %v580_v34 = vpop.permute.xlu0 %579 }
 0x742   :  { %622 = vmatprep.subr.mxu0 %v2937_v5 }
 0x743   :  { %623 = vmatpush1.msra.mxu0 %v2943_v7 }
 0x744   :  { %624 = vmatprep.subr.mxu0 %v2950_v8 }
 0x745   :  { %625 = vmatpush1.msra.mxu0 %v2956_v9  ;;  %v570_v40 = vpop.permute.xlu0 %569 }
 0x746   :  { %626 = vmatprep.subr.mxu0 %v2965_v11 }
 0x747   :  { %627 = vmatpush1.msra.mxu0 %v2971_v12 }
 0x748   :  { %628 = vmatprep.subr.mxu0 %v2977_v13 }
 0x749   :  { %629 = vmatpush1.msra.mxu0 %v2983_v14 }
 0x74a   :  { %630 = vmatprep.subr.mxu0 %v2989_v15 }
 0x74b   :  { %631 = vmatpush1.msra.mxu0 %v2995_v16 }
 0x74c   :  { %632 = vmatprep.subr.mxu0 %v3001_v17 }
 0x74d   :  { %633 = vmatpush1.msra.mxu0 %v3007_v18 }
 0x74e   :  { %2540 = vmatprep.subr.mxu0 %v2825_v4 }
 0x752   :  { %v70_v60 = vpop.permute.xlu0 %69 }
 0x753   :  { %v105_v61 = vmul.f32 %v3024_v26, %v70_v60 }
 0x755   :  { %v120_v62 = vadd.f32 %v3030_v29, %v105_v61 }
 0x7fe   :  { %v554_v51 = vpop.f32.mrf.mxu0 }
 0x7ff   :  { %v555_v24 = vadd.f32 %v3109_v56, %v554_v51 }
 0x800   :  { %v2528_v27 = vpop.f32.mrf.mxu0 }
 0x801   :  { %v561_v28 = vadd.f32 %v559_v25, %v555_v24  ;;  %v572_v45 = vadd.f32 %v570_v40, %v555_v24 }
 0x803   :  { %v2416_v30 = vmul.f32 -1.442695, %v561_v28  ;;  %v2417_v46 = vmul.f32 -1.442695, %v572_v45 }
 0x805   :  { %2666 = vpow2.f32 %v2416_v30 }
 0x812   :  { %v2667_v31 = vpop.eup %2666 }
 0x813   :  { %v565_v32 = vadd.f32 1.0, %v2667_v31 }
 0x815   :  { %2668 = vrcp.f32 %v565_v32 }
 0x822   :  { %v2669_v33 = vpop.eup %2668 }
 0x823   :  { %v582_v35 = vmul.f32 %v2669_v33, %v580_v34 }
 0x825   :  { %584 = vrot.lane.b32.xlu1 %v582_v35, %s2827_s17 }
 0x897   :  { %v585_v36 = vpop.permute.xlu1 %584 }
 0x898   :  { %v587_v38 = vadd.f32 %v585_v36, %v555_v24  ;;  %v51_v36 = vld [vmem:[%s3682_s0 + $0x18] sm:$0xff] }
 0x89a   :  { %2670 = vtanh.f32 %v587_v38 }
 0x89b   :  { %2672 = vpow2.f32 %v2417_v46 }
 0x8a7   :  { %v2671_v39 = vpop.eup %2670 }
 0x8a8   :  { %591 = vrot.lane.b32.xlu1 %v2671_v39, %s2828_s5  ;;  %v2673_v47 = vpop.eup %2672 }
 0x8a9   :  { %v576_v48 = vadd.f32 1.0, %v2673_v47 }
 0x8ab   :  { %2674 = vrcp.f32 %v576_v48 }
 0x8b8   :  { %v2675_v49 = vpop.eup %2674 }
 0x8b9   :  { %v589_v52 = vsub.f32 1.0, %v2675_v49  ;;  %v595_v54 = vmul.f32 %v2675_v49, %v3114_v37 }
 0x91a   :  { %v592_v53 = vpop.permute.xlu1 %591 }
 0x91b   :  { %v594_v55 = vmul.f32 %v592_v53, %v589_v52 }
 0x91d   :  { %v3169_v57 = vadd.f32 %v595_v54, %v594_v55 }
 0x91f   :  { %v598_v58 = vsel %vm269_vm1, %v485_v22, %v3169_v57 }
 0x920   :  { %2418 = vmatmul.mubr.msk.f32.vlgmr.msra.gmra.mxu0 %vm159_vm2, %v598_v58 }
 0x921   :  { %2541 = vmatpush3.msra.mxu0 %v3038_v41  ;;  %2548 = vmatprep.mubr.msk.f32.mxu0 %vm2830_vm0, %v2825_v4 }
 0x922   :  { %2542 = vmatprep.subr.mxu0 %v2825_v4 }
 0x923   :  { %2543 = vmatpush3.msra.mxu0 %v3043_v42 }
 0x924   :  { %2544 = vmatprep.subr.mxu0 %v2825_v4 }
 0x925   :  { %2545 = vmatpush3.msra.mxu0 %v3051_v43 }
 0x926   :  { %2546 = vmatprep.subr.mxu0 %v2825_v4 }
 0x927   :  { %2547 = vmatpush3.msra.mxu0 %v3061_v44 }
 0x928   :  { %1050 = vmatprep.subr.mxu0 %v2914_v0 }
 0x9e0   :  { %v668_v37 = vpop.f32.mrf.mxu0 }
 0x9e1   :  { %v669_v59 = vadd.f32 %v668_v37, %v3017_v23 }
 0x9e2   :  { %v670_v34 = vpop.f32.mrf.mxu0 }
 0x9e3   :  { %681 = vrot.lane.b32.xlu1 %v669_v59, %s2827_s17  ;;  %v673_v63 = vadd.f32 %v669_v59, %v120_v62  ;;  %v671_v35 = vadd.f32 %v670_v34, %v3076_v50 }
 0x9e5   :  { %v2419_v6 = vmul.f32 -1.442695, %v673_v63 }
 0x9e7   :  { %2676 = vpow2.f32 %v2419_v6 }
 0x9f4   :  { %v2677_v19 = vpop.eup %2676 }
 0x9f5   :  { %v677_v20 = vadd.f32 1.0, %v2677_v19 }
 0x9f7   :  { %2678 = vrcp.f32 %v677_v20 }
 0xa04   :  { %v2679_v21 = vpop.eup %2678 }
 0xa05   :  { %v691_v28 = vsub.f32 1.0, %v2679_v21  ;;  %v697_v31 = vmul.f32 %v2679_v21, %v3137_v10 }
 0xa55   :  { %v682_v22 = vpop.permute.xlu1 %681 }
 0xa56   :  { %v684_v51 = vmul.f32 %v2679_v21, %v682_v22 }
 0xa58   :  { %686 = vrot.lane.b32.xlu0 %v684_v51, %s2827_s17 }
 0xaca   :  { %v687_v24 = vpop.permute.xlu0 %686 }
 0xacb   :  { %v689_v25 = vadd.f32 %v687_v24, %v120_v62 }
 0xacd   :  { %2680 = vtanh.f32 %v689_v25 }
 0xada   :  { %v2681_v27 = vpop.eup %2680 }
 0xadb   :  { %693 = vrot.lane.b32.xlu1 %v2681_v27, %s2828_s5 }
 0xadf   :  { %774 = vrot.lane.b32.xlu1 %v669_v59, %s2829_s26 }
 0xb4d   :  { %v694_v30 = vpop.permute.xlu1 %693 }
 0xb4e   :  { %v696_v32 = vmul.f32 %v694_v30, %v691_v28 }
 0xb50   :  { %v3192_v33 = vadd.f32 %v697_v31, %v696_v32 }
 0xb51   :  { %v775_v40 = vpop.permute.xlu1 %774 }
 0xb52   :  { %700 = vrot.lane.b32.xlu0 %v3192_v33, %s2828_s5 }
 0xb56   :  { %795 = vrot.lane.b32.xlu0 %v671_v35, %s2828_s5 }
 0xb5a   :  { %785 = vrot.lane.b32.xlu0 %v671_v35, %s2829_s26 }
 0xb5e   :  { %74 = vperm.xlu0 %2643, %v51_v36  }
 0xbc4   :  { %v701_v38 = vpop.permute.xlu0 %700 }
 0xbc5   :  { %2538 = vmatmul.mubr.msk.f32.vlgmr.msra.gmra.mxu1 %vm269_vm1, %v701_v38 }
 0xbc6   :  { %835 = vmatpush1.msra.mxu1 %v2919_v1  ;;  %882 = vmatprep.mubr.f32.mxu1 %v2825_v4 }
 0xbc7   :  { %836 = vmatprep.subr.mxu1 %v2924_v2 }
 0xbc8   :  { %837 = vmatpush1.msra.mxu1 %v2930_v3  ;;  %v796_v53 = vpop.permute.xlu0 %795 }
 0xbc9   :  { %838 = vmatprep.subr.mxu1 %v2937_v5 }
 0xbca   :  { %839 = vmatpush1.msra.mxu1 %v2943_v7 }
 0xbcb   :  { %840 = vmatprep.subr.mxu1 %v2950_v8 }
 0xbcc   :  { %841 = vmatpush1.msra.mxu1 %v2956_v9  ;;  %v786_v59 = vpop.permute.xlu0 %785 }
 0xbcd   :  { %842 = vmatprep.subr.mxu1 %v2965_v11 }
 0xbce   :  { %843 = vmatpush1.msra.mxu1 %v2971_v12 }
 0xbcf   :  { %844 = vmatprep.subr.mxu1 %v2977_v13 }
 0xbd0   :  { %845 = vmatpush1.msra.mxu1 %v2983_v14 }
 0xbd1   :  { %846 = vmatprep.subr.mxu1 %v2989_v15 }
 0xbd2   :  { %847 = vmatpush1.msra.mxu1 %v2995_v16 }
 0xbd3   :  { %848 = vmatprep.subr.mxu1 %v3001_v17 }
 0xbd4   :  { %849 = vmatpush1.msra.mxu1 %v3007_v18 }
 0xbd5   :  { %2551 = vmatprep.subr.mxu1 %v2825_v4 }
 0xbd9   :  { %v75_v27 = vpop.permute.xlu0 %74 }
 0xbda   :  { %v106_v28 = vmul.f32 %v3024_v26, %v75_v27 }
 0xbdc   :  { %v121_v30 = vadd.f32 %v3030_v29, %v106_v28 }
 0xc85   :  { %v770_v10 = vpop.f32.mrf.mxu1 }
 0xc86   :  { %v771_v39 = vadd.f32 %v3109_v56, %v770_v10 }
 0xc87   :  { %v2539_v45 = vpop.f32.mrf.mxu1 }
 0xc88   :  { %v777_v46 = vadd.f32 %v775_v40, %v771_v39  ;;  %v788_v60 = vadd.f32 %v786_v59, %v771_v39 }
 0xc8a   :  { %v2421_v47 = vmul.f32 -1.442695, %v777_v46  ;;  %v2422_v61 = vmul.f32 -1.442695, %v788_v60 }
 0xc8c   :  { %2682 = vpow2.f32 %v2421_v47 }
 0xc99   :  { %v2683_v48 = vpop.eup %2682 }
 0xc9a   :  { %v781_v49 = vadd.f32 1.0, %v2683_v48 }
 0xc9c   :  { %2684 = vrcp.f32 %v781_v49 }
 0xca9   :  { %v2685_v52 = vpop.eup %2684 }
 0xcaa   :  { %v798_v54 = vmul.f32 %v2685_v52, %v796_v53 }
 0xcac   :  { %800 = vrot.lane.b32.xlu1 %v798_v54, %s2827_s17 }
 0xd1e   :  { %v801_v55 = vpop.permute.xlu1 %800 }
 0xd1f   :  { %v803_v58 = vadd.f32 %v801_v55, %v771_v39  ;;  %v52_v55 = vld [vmem:[%s3682_s0 + $0x20] sm:$0xff] }
 0xd21   :  { %2686 = vtanh.f32 %v803_v58 }
 0xd22   :  { %2688 = vpow2.f32 %v2422_v61 }
 0xd2e   :  { %v2687_v37 = vpop.eup %2686 }
 0xd2f   :  { %807 = vrot.lane.b32.xlu1 %v2687_v37, %s2828_s5  ;;  %v2689_v62 = vpop.eup %2688 }
 0xd30   :  { %v792_v63 = vadd.f32 1.0, %v2689_v62 }
 0xd32   :  { %2690 = vrcp.f32 %v792_v63 }
 0xd3f   :  { %v2691_v6 = vpop.eup %2690 }
 0xd40   :  { %v805_v19 = vsub.f32 1.0, %v2691_v6  ;;  %v811_v21 = vmul.f32 %v2691_v6, %v3169_v57 }
 0xda1   :  { %v808_v20 = vpop.permute.xlu1 %807 }
 0xda2   :  { %v810_v22 = vmul.f32 %v808_v20, %v805_v19 }
 0xda4   :  { %v3224_v51 = vadd.f32 %v811_v21, %v810_v22 }
 0xda6   :  { %v814_v24 = vsel %vm269_vm1, %v701_v38, %v3224_v51 }
 0xda7   :  { %2423 = vmatmul.mubr.msk.f32.vlgmr.msra.gmra.mxu1 %vm159_vm2, %v814_v24 }
 0xda8   :  { %2552 = vmatpush3.msra.mxu1 %v3038_v41  ;;  %2559 = vmatprep.mubr.msk.f32.mxu1 %vm2830_vm0, %v2825_v4 }
 0xda9   :  { %2553 = vmatprep.subr.mxu1 %v2825_v4 }
 0xdaa   :  { %2554 = vmatpush3.msra.mxu1 %v3043_v42 }
 0xdab   :  { %2555 = vmatprep.subr.mxu1 %v2825_v4 }
 0xdac   :  { %2556 = vmatpush3.msra.mxu1 %v3051_v43 }
 0xdad   :  { %2557 = vmatprep.subr.mxu1 %v2825_v4 }
 0xdae   :  { %2558 = vmatpush3.msra.mxu1 %v3061_v44 }
 0xdaf   :  { %1266 = vmatprep.subr.mxu1 %v2914_v0 }
 0xe67   :  { %v884_v57 = vpop.f32.mrf.mxu1 }
 0xe68   :  { %v885_v25 = vadd.f32 %v884_v57, %v3017_v23 }
 0xe69   :  { %v886_v53 = vpop.f32.mrf.mxu1 }
 0xe6a   :  { %897 = vrot.lane.b32.xlu1 %v885_v25, %s2827_s17  ;;  %v889_v31 = vadd.f32 %v885_v25, %v121_v30  ;;  %v887_v54 = vadd.f32 %v886_v53, %v3076_v50 }
 0xe6c   :  { %v2424_v32 = vmul.f32 -1.442695, %v889_v31 }
 0xe6e   :  { %2692 = vpow2.f32 %v2424_v32 }
 0xe7b   :  { %v2693_v34 = vpop.eup %2692 }
 0xe7c   :  { %v893_v35 = vadd.f32 1.0, %v2693_v34 }
 0xe7e   :  { %2694 = vrcp.f32 %v893_v35 }
 0xe8b   :  { %v2695_v36 = vpop.eup %2694 }
 0xe8c   :  { %v907_v46 = vsub.f32 1.0, %v2695_v36  ;;  %v913_v48 = vmul.f32 %v2695_v36, %v3192_v33 }
 0xedc   :  { %v898_v38 = vpop.permute.xlu1 %897 }
 0xedd   :  { %v900_v10 = vmul.f32 %v2695_v36, %v898_v38 }
 0xedf   :  { %902 = vrot.lane.b32.xlu0 %v900_v10, %s2827_s17 }
 0xf51   :  { %v903_v39 = vpop.permute.xlu0 %902 }
 0xf52   :  { %v905_v40 = vadd.f32 %v903_v39, %v121_v30 }
 0xf54   :  { %2696 = vtanh.f32 %v905_v40 }
 0xf61   :  { %v2697_v45 = vpop.eup %2696 }
 0xf62   :  { %909 = vrot.lane.b32.xlu1 %v2697_v45, %s2828_s5 }
 0xf66   :  { %990 = vrot.lane.b32.xlu1 %v885_v25, %s2829_s26 }
 0xfd4   :  { %v910_v47 = vpop.permute.xlu1 %909 }
 0xfd5   :  { %v912_v49 = vmul.f32 %v910_v47, %v907_v46 }
 0xfd7   :  { %v3247_v52 = vadd.f32 %v913_v48, %v912_v49 }
 0xfd8   :  { %v991_v59 = vpop.permute.xlu1 %990 }
 0xfd9   :  { %916 = vrot.lane.b32.xlu0 %v3247_v52, %s2828_s5 }
 0xfdd   :  { %1011 = vrot.lane.b32.xlu0 %v887_v54, %s2828_s5 }
 0xfe1   :  { %1001 = vrot.lane.b32.xlu0 %v887_v54, %s2829_s26 }
 0xfe5   :  { %79 = vperm.xlu0 %2643, %v52_v55  }
0x104b   :  { %v917_v58 = vpop.permute.xlu0 %916 }
0x104c   :  { %2549 = vmatmul.mubr.msk.f32.vlgmr.msra.gmra.mxu0 %vm269_vm1, %v917_v58 }
0x104d   :  { %1051 = vmatpush1.msra.mxu0 %v2919_v1  ;;  %1098 = vmatprep.mubr.f32.mxu0 %v2825_v4 }
0x104e   :  { %1052 = vmatprep.subr.mxu0 %v2924_v2 }
0x104f   :  { %1053 = vmatpush1.msra.mxu0 %v2930_v3  ;;  %v1012_v20 = vpop.permute.xlu0 %1011 }
0x1050   :  { %1054 = vmatprep.subr.mxu0 %v2937_v5 }
0x1051   :  { %1055 = vmatpush1.msra.mxu0 %v2943_v7 }
0x1052   :  { %1056 = vmatprep.subr.mxu0 %v2950_v8 }
0x1053   :  { %1057 = vmatpush1.msra.mxu0 %v2956_v9  ;;  %v1002_v25 = vpop.permute.xlu0 %1001 }
0x1054   :  { %1058 = vmatprep.subr.mxu0 %v2965_v11 }
0x1055   :  { %1059 = vmatpush1.msra.mxu0 %v2971_v12 }
0x1056   :  { %1060 = vmatprep.subr.mxu0 %v2977_v13 }
0x1057   :  { %1061 = vmatpush1.msra.mxu0 %v2983_v14 }
0x1058   :  { %1062 = vmatprep.subr.mxu0 %v2989_v15 }
0x1059   :  { %1063 = vmatpush1.msra.mxu0 %v2995_v16 }
0x105a   :  { %1064 = vmatprep.subr.mxu0 %v3001_v17 }
0x105b   :  { %1065 = vmatpush1.msra.mxu0 %v3007_v18 }
0x105c   :  { %2562 = vmatprep.subr.mxu0 %v2825_v4 }
0x1060   :  { %v80_v45 = vpop.permute.xlu0 %79 }
0x1061   :  { %v107_v46 = vmul.f32 %v3024_v26, %v80_v45 }
0x1063   :  { %v122_v47 = vadd.f32 %v3030_v29, %v107_v46 }
0x110c   :  { %v986_v33 = vpop.f32.mrf.mxu0 }
0x110d   :  { %v987_v37 = vadd.f32 %v3109_v56, %v986_v33 }
0x110e   :  { %v2550_v60 = vpop.f32.mrf.mxu0 }
0x110f   :  { %v993_v61 = vadd.f32 %v991_v59, %v987_v37  ;;  %v1004_v27 = vadd.f32 %v1002_v25, %v987_v37 }
0x1111   :  { %v2426_v62 = vmul.f32 -1.442695, %v993_v61  ;;  %v2427_v28 = vmul.f32 -1.442695, %v1004_v27 }
0x1113   :  { %2698 = vpow2.f32 %v2426_v62 }
0x1120   :  { %v2699_v63 = vpop.eup %2698 }
0x1121   :  { %v997_v6 = vadd.f32 1.0, %v2699_v63 }
0x1123   :  { %2700 = vrcp.f32 %v997_v6 }
0x1130   :  { %v2701_v19 = vpop.eup %2700 }
0x1131   :  { %v1014_v21 = vmul.f32 %v2701_v19, %v1012_v20  ;;  %v53_v20 = vld [vmem:[%s3682_s0 + $0x28] sm:$0xff] }
0x1133   :  { %1016 = vrot.lane.b32.xlu1 %v1014_v21, %s2827_s17 }
0x11a5   :  { %v1017_v22 = vpop.permute.xlu1 %1016 }
0x11a6   :  { %v1019_v24 = vadd.f32 %v1017_v22, %v987_v37 }
0x11a8   :  { %2702 = vtanh.f32 %v1019_v24 }
0x11a9   :  { %2704 = vpow2.f32 %v2427_v28 }
0x11b5   :  { %v2703_v57 = vpop.eup %2702 }
0x11b6   :  { %1023 = vrot.lane.b32.xlu1 %v2703_v57, %s2828_s5  ;;  %v2705_v30 = vpop.eup %2704 }
0x11b7   :  { %v1008_v31 = vadd.f32 1.0, %v2705_v30 }
0x11b9   :  { %2706 = vrcp.f32 %v1008_v31 }
0x11c6   :  { %v2707_v32 = vpop.eup %2706 }
0x11c7   :  { %v1021_v34 = vsub.f32 1.0, %v2707_v32  ;;  %v1027_v36 = vmul.f32 %v2707_v32, %v3224_v51 }
0x1228   :  { %v1024_v35 = vpop.permute.xlu1 %1023 }
0x1229   :  { %v1026_v38 = vmul.f32 %v1024_v35, %v1021_v34  ;;  %v2780_v35 = vld [vmem:[%s3686_s4 + $0x78] sm:$0xff] }
0x122b   :  { %v3279_v10 = vadd.f32 %v1027_v36, %v1026_v38 }
0x122d   :  { %v1030_v39 = vsel %vm269_vm1, %v917_v58, %v3279_v10 }
0x122e   :  { %2428 = vmatmul.mubr.msk.f32.vlgmr.msra.gmra.mxu0 %vm159_vm2, %v1030_v39 }
0x122f   :  { %2563 = vmatpush3.msra.mxu0 %v3038_v41  ;;  %2570 = vmatprep.mubr.msk.f32.mxu0 %vm2830_vm0, %v2825_v4 }
0x1230   :  { %2564 = vmatprep.subr.mxu0 %v2825_v4 }
0x1231   :  { %2565 = vmatpush3.msra.mxu0 %v3043_v42 }
0x1232   :  { %2566 = vmatprep.subr.mxu0 %v2825_v4 }
0x1233   :  { %2567 = vmatpush3.msra.mxu0 %v3051_v43 }
0x1234   :  { %2568 = vmatprep.subr.mxu0 %v2825_v4 }
0x1235   :  { %2569 = vmatpush3.msra.mxu0 %v3061_v44 }
0x1236   :  { %1482 = vmatprep.subr.mxu0 %v2914_v0 }
0x12ee   :  { %v1100_v51 = vpop.f32.mrf.mxu0 }
0x12ef   :  { %v1101_v40 = vadd.f32 %v1100_v51, %v3017_v23 }
0x12f0   :  { %v1102_v6 = vpop.f32.mrf.mxu0 }
0x12f1   :  { %1113 = vrot.lane.b32.xlu1 %v1101_v40, %s2827_s17  ;;  %v1105_v48 = vadd.f32 %v1101_v40, %v122_v47  ;;  %v1103_v19 = vadd.f32 %v1102_v6, %v3076_v50  ;;  %v3406_v6 = vld [vmem:[%s3686_s4 + $0x50] sm:$0xff] }
0x12f3   :  { %v2429_v49 = vmul.f32 -1.442695, %v1105_v48 }
0x12f5   :  { %2708 = vpow2.f32 %v2429_v49 }
0x1302   :  { %v2709_v53 = vpop.eup %2708 }
0x1303   :  { %v1109_v54 = vadd.f32 1.0, %v2709_v53 }
0x1305   :  { %2710 = vrcp.f32 %v1109_v54 }
0x1312   :  { %v2711_v55 = vpop.eup %2710 }
0x1313   :  { %v1123_v26 = vsub.f32 1.0, %v2711_v55  ;;  %v1129_v61 = vmul.f32 %v2711_v55, %v3247_v52 }
0x1363   :  { %v1114_v58 = vpop.permute.xlu1 %1113 }
0x1364   :  { %v1116_v33 = vmul.f32 %v2711_v55, %v1114_v58 }
0x1366   :  { %1118 = vrot.lane.b32.xlu0 %v1116_v33, %s2827_s17 }
0x13d8   :  { %v1119_v0 = vpop.permute.xlu0 %1118 }
0x13d9   :  { %v1121_v37 = vadd.f32 %v1119_v0, %v122_v47 }
0x13db   :  { %2712 = vtanh.f32 %v1121_v37 }
0x13e8   :  { %v2713_v59 = vpop.eup %2712 }
0x13e9   :  { %1125 = vrot.lane.b32.xlu1 %v2713_v59, %s2828_s5  ;;  %v54_v59 = vld [vmem:[%s3682_s0 + $0x30] sm:$0xff] }
0x13ed   :  { %1206 = vrot.lane.b32.xlu1 %v1101_v40, %s2829_s26 }
0x145b   :  { %v1126_v60 = vpop.permute.xlu1 %1125 }
0x145c   :  { %v1128_v62 = vmul.f32 %v1126_v60, %v1123_v26  ;;  %v3381_v60 = vld [vmem:[%s3686_s4 + $0x70] sm:$0xff] }
0x145e   :  { %v3302_v63 = vadd.f32 %v1129_v61, %v1128_v62  ;;  %v3388_v61 = vld [vmem:[%s3686_s4 + $0x68] sm:$0xff]  ;;  %v3394_v62 = vld [vmem:[%s3686_s4 + $0x60] sm:$0xff] }
0x1460   :  { %1132 = vrot.lane.b32.xlu0 %v3302_v63, %s2828_s5 }
0x1464   :  { %1227 = vrot.lane.b32.xlu0 %v1103_v19, %s2828_s5 }
0x1468   :  { %1217 = vrot.lane.b32.xlu0 %v1103_v19, %s2829_s26  ;;  %v3412_v19 = vld [vmem:[%s3686_s4 + $0x48] sm:$0xff] }
0x146c   :  { %84 = vperm.xlu0 %2643, %v53_v20   ;;  %v3418_v20 = vld [vmem:[%s3686_s4 + $0x40] sm:$0xff] }
0x14d2   :  { %v1133_v21 = vpop.permute.xlu0 %1132 }
0x14d3   :  { %2560 = vmatmul.mubr.msk.f32.vlgmr.msra.gmra.mxu1 %vm269_vm1, %v1133_v21 }
0x14d4   :  { %1267 = vmatpush1.msra.mxu1 %v2919_v1  ;;  %1314 = vmatprep.mubr.f32.mxu1 %v2825_v4 }
0x14d5   :  { %1268 = vmatprep.subr.mxu1 %v2924_v2 }
0x14d6   :  { %1269 = vmatpush1.msra.mxu1 %v2930_v3  ;;  %v1207_v3 = vpop.permute.xlu1 %1206 }
0x14d7   :  { %1270 = vmatprep.subr.mxu1 %v2937_v5 }
0x14d8   :  { %1271 = vmatpush1.msra.mxu1 %v2943_v7 }
0x14d9   :  { %1272 = vmatprep.subr.mxu1 %v2950_v8 }
0x14da   :  { %1273 = vmatpush1.msra.mxu1 %v2956_v9 }
0x14db   :  { %1274 = vmatprep.subr.mxu1 %v2965_v11 }
0x14dc   :  { %1275 = vmatpush1.msra.mxu1 %v2971_v12 }
0x14dd   :  { %1276 = vmatprep.subr.mxu1 %v2977_v13  ;;  %v1228_v13 = vpop.permute.xlu0 %1227 }
0x14de   :  { %1277 = vmatpush1.msra.mxu1 %v2983_v14 }
0x14df   :  { %1278 = vmatprep.subr.mxu1 %v2989_v15 }
0x14e0   :  { %1279 = vmatpush1.msra.mxu1 %v2995_v16 }
0x14e1   :  { %1280 = vmatprep.subr.mxu1 %v3001_v17 }
0x14e2   :  { %1281 = vmatpush1.msra.mxu1 %v3007_v18  ;;  %v1218_v18 = vpop.permute.xlu0 %1217 }
0x14e3   :  { %2573 = vmatprep.subr.mxu1 %v2825_v4 }
0x14e7   :  { %v85_v38 = vpop.permute.xlu0 %84 }
0x1593   :  { %v1202_v1 = vpop.f32.mrf.mxu1 }
0x1594   :  { %v1203_v2 = vadd.f32 %v3109_v56, %v1202_v1  ;;  %v3430_v1 = vld [vmem:[%s3686_s4 + $0x30] sm:$0xff] }
0x1595   :  { %v2561_v5 = vpop.f32.mrf.mxu1 }
0x1596   :  { %v1209_v7 = vadd.f32 %v1207_v3, %v1203_v2  ;;  %v1220_v52 = vadd.f32 %v1218_v18, %v1203_v2  ;;  %v3442_v3 = vld [vmem:[%s3686_s4 + $0x20] sm:$0xff]  ;;  %v3448_v5 = vld [vmem:[%s3686_s4 + $0x18] sm:$0xff] }
0x1598   :  { %v2431_v8 = vmul.f32 -1.442695, %v1209_v7  ;;  %v2432_v22 = vmul.f32 -1.442695, %v1220_v52  ;;  %v3454_v7 = vld [vmem:[%s3686_s4 + $0x10] sm:$0xff] }
0x159a   :  { %2714 = vpow2.f32 %v2431_v8  ;;  %v3460_v8 = vld [vmem:[%s3686_s4 + $0x8] sm:$0xff] }
0x15a7   :  { %v2715_v9 = vpop.eup %2714 }
0x15a8   :  { %v1213_v11 = vadd.f32 1.0, %v2715_v9  ;;  %v3466_v9 = vld [vmem:[%s3686_s4] sm:$0xff] }
0x15aa   :  { %2716 = vrcp.f32 %v1213_v11 }
0x15b7   :  { %v2717_v12 = vpop.eup %2716 }
0x15b8   :  { %v1230_v14 = vmul.f32 %v2717_v12, %v1228_v13 }
0x15ba   :  { %1232 = vrot.lane.b32.xlu1 %v1230_v14, %s2827_s17 }
0x162c   :  { %v1233_v15 = vpop.permute.xlu1 %1232 }
0x162d   :  { %v1235_v16 = vadd.f32 %v1233_v15, %v1203_v2  ;;  %v3436_v2 = vld [vmem:[%s3686_s4 + $0x28] sm:$0xff] }
0x162f   :  { %2718 = vtanh.f32 %v1235_v16 }
0x1630   :  { %2720 = vpow2.f32 %v2432_v22 }
0x163c   :  { %v2719_v17 = vpop.eup %2718 }
0x163d   :  { %1239 = vrot.lane.b32.xlu1 %v2719_v17, %s2828_s5  ;;  %v2721_v24 = vpop.eup %2720 }
0x163e   :  { %v1224_v57 = vadd.f32 1.0, %v2721_v24 }
0x1640   :  { %2722 = vrcp.f32 %v1224_v57 }
0x164d   :  { %v2723_v25 = vpop.eup %2722 }
0x164e   :  { %v1237_v27 = vsub.f32 1.0, %v2723_v25  ;;  %v1243_v30 = vmul.f32 %v2723_v25, %v3279_v10 }
0x16af   :  { %v1240_v28 = vpop.permute.xlu1 %1239 }
0x16b0   :  { %v1242_v31 = vmul.f32 %v1240_v28, %v1237_v27 }
0x16b2   :  { %v3334_v32 = vadd.f32 %v1243_v30, %v1242_v31 }
0x16b4   :  { %v1246_v34 = vsel %vm269_vm1, %v1133_v21, %v3334_v32  ;;  %v3424_v21 = vld [vmem:[%s3686_s4 + $0x38] sm:$0xff] }
0x16b5   :  { %2433 = vmatmul.mubr.msk.f32.vlgmr.msra.gmra.mxu1 %vm159_vm2, %v1246_v34 }
0x16b6   :  { %2574 = vmatpush3.msra.mxu1 %v3038_v41  ;;  %2581 = vmatprep.mubr.msk.f32.mxu1 %vm2830_vm0, %v2825_v4 }
0x16b7   :  { %2575 = vmatprep.subr.mxu1 %v2825_v4 }
0x16b8   :  { %2576 = vmatpush3.msra.mxu1 %v3043_v42  ;;  %v3356_v42 = vld [vmem:[%s3684_s2] ss:$0 sm:$0xff] }
0x16b9   :  { %2577 = vmatprep.subr.mxu1 %v2825_v4 }
0x16ba   :  { %2578 = vmatpush3.msra.mxu1 %v3051_v43  ;;  %v108_v43 = vmul.f32 %v3356_v42, %v85_v38 }
0x16bb   :  { %2579 = vmatprep.subr.mxu1 %v2825_v4 }
0x16bc   :  { %2580 = vmatpush3.msra.mxu1 %v3061_v44  ;;  %v123_v44 = vadd.f32 %v3030_v29, %v108_v43 }
0x16bd   :  { %1698 = vmatprep.subr.mxu1 %v2780_v35 }
0x1775   :  { %v1316_v41 = vpop.f32.mrf.mxu1 }
0x1776   :  { %v1317_v36 = vadd.f32 %v1316_v41, %v3017_v23 }
0x1777   :  { %v1318_v0 = vpop.f32.mrf.mxu1 }
0x1778   :  { %1329 = vrot.lane.b32.xlu1 %v1317_v36, %s2827_s17  ;;  %v1321_v10 = vadd.f32 %v1317_v36, %v123_v44  ;;  %v1319_v37 = vadd.f32 %v1318_v0, %v3076_v50 }
0x177a   :  { %v2434_v39 = vmul.f32 -1.442695, %v1321_v10 }
0x177c   :  { %2724 = vpow2.f32 %v2434_v39  ;;  %v2797_v39 = vld [vmem:[%s3688_s6 + $0x18] sm:$0xff] }
0x1789   :  { %v2725_v51 = vpop.eup %2724 }
0x178a   :  { %v1325_v40 = vadd.f32 1.0, %v2725_v51  ;;  %v2799_v51 = vld [vmem:[%s3688_s6 + $0x8] sm:$0xff] }
0x178c   :  { %2726 = vrcp.f32 %v1325_v40  ;;  %v2800_v40 = vld [vmem:[%s3688_s6] sm:$0xff] }
0x1799   :  { %v2727_v45 = vpop.eup %2726 }
0x179a   :  { %v1339_v29 = vsub.f32 1.0, %v2727_v45  ;;  %v1345_v55 = vmul.f32 %v2727_v45, %v3302_v63  ;;  %v3400_v63 = vld [vmem:[%s3686_s4 + $0x58] sm:$0xff] }
0x17ea   :  { %v1330_v46 = vpop.permute.xlu1 %1329 }
0x17eb   :  { %v1332_v47 = vmul.f32 %v2727_v45, %v1330_v46 }
0x17ed   :  { %1334 = vrot.lane.b32.xlu0 %v1332_v47, %s2827_s17 }
0x185f   :  { %v1335_v48 = vpop.permute.xlu0 %1334 }
0x1860   :  { %v1337_v49 = vadd.f32 %v1335_v48, %v123_v44 }
0x1862   :  { %2728 = vtanh.f32 %v1337_v49  ;;  %v3504_v49 = vld [vmem:[%s3685_s3] ss:$0 sm:$0xff] }
0x186f   :  { %v2729_v53 = vpop.eup %2728 }
0x1870   :  { %1341 = vrot.lane.b32.xlu1 %v2729_v53, %s2828_s5 }
0x1874   :  { %1422 = vrot.lane.b32.xlu1 %v1317_v36, %s2829_s26 }
0x18e2   :  { %v1342_v54 = vpop.permute.xlu1 %1341 }
0x18e3   :  { %v1344_v58 = vmul.f32 %v1342_v54, %v1339_v29 }
0x18e5   :  { %v3364_v33 = vadd.f32 %v1345_v55, %v1344_v58 }
0x18e6   :  { %v1423_v13 = vpop.permute.xlu1 %1422 }
0x18e7   :  { %1348 = vrot.lane.b32.xlu0 %v3364_v33, %s2828_s5 }
0x18eb   :  { %1443 = vrot.lane.b32.xlu0 %v1319_v37, %s2828_s5 }
0x18ef   :  { %1433 = vrot.lane.b32.xlu0 %v1319_v37, %s2829_s26 }
0x18f3   :  { %89 = vperm.xlu0 %2643, %v54_v59  }
0x1959   :  { %v3374_v26 = vpop.permute.xlu0 %1348 }
0x195a   :  { %2571 = vmatmul.mubr.msk.f32.vlgmr.msra.gmra.mxu0 %vm269_vm1, %v3374_v26 }
0x195b   :  { %1483 = vmatpush1.msra.mxu0 %v3381_v60  ;;  %1530 = vmatprep.mubr.f32.mxu0 %v2825_v4 }
0x195c   :  { %1484 = vmatprep.subr.mxu0 %v3388_v61 }
0x195d   :  { %1485 = vmatpush1.msra.mxu0 %v3394_v62  ;;  %v1444_v22 = vpop.permute.xlu0 %1443 }
0x195e   :  { %1486 = vmatprep.subr.mxu0 %v3400_v63 }
0x195f   :  { %1487 = vmatpush1.msra.mxu0 %v3406_v6 }
0x1960   :  { %1488 = vmatprep.subr.mxu0 %v3412_v19 }
0x1961   :  { %1489 = vmatpush1.msra.mxu0 %v3418_v20 }
0x1962   :  { %1490 = vmatprep.subr.mxu0 %v3424_v21 }
0x1963   :  { %1491 = vmatpush1.msra.mxu0 %v3430_v1 }
0x1964   :  { %1492 = vmatprep.subr.mxu0 %v3436_v2 }
0x1965   :  { %1493 = vmatpush1.msra.mxu0 %v3442_v3 }
0x1966   :  { %1494 = vmatprep.subr.mxu0 %v3448_v5 }
0x1967   :  { %1495 = vmatpush1.msra.mxu0 %v3454_v7 }
0x1968   :  { %1496 = vmatprep.subr.mxu0 %v3460_v8 }
0x1969   :  { %1497 = vmatpush1.msra.mxu0 %v3466_v9 }
0x196a   :  { %2584 = vmatprep.subr.mxu0 %v2825_v4 }
0x1a1a   :  { %v1418_v11 = vpop.f32.mrf.mxu0 }
0x1a1b   :  { %v1419_v12 = vadd.f32 %v3109_v56, %v1418_v11  ;;  %v1434_v56 = vpop.permute.xlu0 %1433 }
0x1a1c   :  { %v2572_v14 = vpop.f32.mrf.mxu0 }
0x1a1d   :  { %v1425_v15 = vadd.f32 %v1423_v13, %v1419_v12  ;;  %v1436_v28 = vadd.f32 %v1434_v56, %v1419_v12 }
0x1a1f   :  { %v2436_v16 = vmul.f32 -1.442695, %v1425_v15  ;;  %v2437_v30 = vmul.f32 -1.442695, %v1436_v28  ;;  %v90_v47 = vpop.permute.xlu0 %89 }
0x1a20   :  { %v109_v48 = vmul.f32 %v3356_v42, %v90_v47 }
0x1a21   :  { %2730 = vpow2.f32 %v2436_v16 }
0x1a22   :  { %v124_v53 = vadd.f32 %v3504_v49, %v109_v48 }
0x1a2e   :  { %v2731_v17 = vpop.eup %2730 }
0x1a2f   :  { %v1429_v18 = vadd.f32 1.0, %v2731_v17 }
0x1a31   :  { %2732 = vrcp.f32 %v1429_v18 }
0x1a3e   :  { %v2733_v52 = vpop.eup %2732 }
0x1a3f   :  { %v1446_v24 = vmul.f32 %v2733_v52, %v1444_v22  ;;  %v55_v22 = vld [vmem:[%s3682_s0 + $0x38] sm:$0xff] }
0x1a41   :  { %1448 = vrot.lane.b32.xlu1 %v1446_v24, %s2827_s17 }
0x1ab3   :  { %v1449_v57 = vpop.permute.xlu1 %1448 }
0x1ab4   :  { %v1451_v25 = vadd.f32 %v1449_v57, %v1419_v12 }
0x1ab6   :  { %2734 = vtanh.f32 %v1451_v25 }
0x1ab7   :  { %2736 = vpow2.f32 %v2437_v30 }
0x1ac3   :  { %v2735_v27 = vpop.eup %2734 }
0x1ac4   :  { %1455 = vrot.lane.b32.xlu1 %v2735_v27, %s2828_s5  ;;  %v2737_v31 = vpop.eup %2736 }
0x1ac5   :  { %v1440_v34 = vadd.f32 1.0, %v2737_v31 }
0x1ac7   :  { %2738 = vrcp.f32 %v1440_v34 }
0x1ad4   :  { %v2739_v35 = vpop.eup %2738 }
0x1ad5   :  { %v1453_v41 = vsub.f32 1.0, %v2739_v35  ;;  %v1459_v38 = vmul.f32 %v2739_v35, %v3334_v32  ;;  %v2798_v32 = vld [vmem:[%s3688_s6 + $0x10] sm:$0xff] }
0x1b36   :  { %v1456_v36 = vpop.permute.xlu1 %1455 }
0x1b37   :  { %v1458_v43 = vmul.f32 %v1456_v36, %v1453_v41 }
0x1b39   :  { %v3474_v44 = vadd.f32 %v1459_v38, %v1458_v43 }
0x1b3b   :  { %v1462_v10 = vsel %vm269_vm1, %v3374_v26, %v3474_v44 }
0x1b3c   :  { %2438 = vmatmul.mubr.msk.f32.vlgmr.msra.gmra.mxu0 %vm159_vm2, %v1462_v10 }
0x1b3d   :  { %2585 = vmatpush3.msra.mxu0 %v2797_v39  ;;  %2592 = vmatprep.mubr.msk.f32.mxu0 %vm2830_vm0, %v2825_v4 }
0x1b3e   :  { %2586 = vmatprep.subr.mxu0 %v2825_v4 }
0x1b3f   :  { %2587 = vmatpush3.msra.mxu0 %v2798_v32 }
0x1b40   :  { %2588 = vmatprep.subr.mxu0 %v2825_v4 }
0x1b41   :  { %2589 = vmatpush3.msra.mxu0 %v2799_v51 }
0x1b42   :  { %2590 = vmatprep.subr.mxu0 %v2825_v4 }
0x1b43   :  { %2591 = vmatpush3.msra.mxu0 %v2800_v40 }
0x1b44   :  { %2595 = vmatprep.subr.mxu0 %v2825_v4 }
0x1bfc   :  { %v1532_v45 = vpop.f32.mrf.mxu0 }
0x1bfd   :  { %v1533_v46 = vadd.f32 %v1532_v45, %v3017_v23 }
0x1bfe   :  { %v1534_v18 = vpop.f32.mrf.mxu0 }
0x1bff   :  { %1545 = vrot.lane.b32.xlu1 %v1533_v46, %s2827_s17  ;;  %v1537_v29 = vadd.f32 %v1533_v46, %v124_v53  ;;  %v1535_v52 = vadd.f32 %v1534_v18, %v3076_v50 }
0x1c01   :  { %v2439_v54 = vmul.f32 -1.442695, %v1537_v29 }
0x1c03   :  { %2740 = vpow2.f32 %v2439_v54 }
0x1c10   :  { %v2741_v55 = vpop.eup %2740 }
0x1c11   :  { %v1541_v58 = vadd.f32 1.0, %v2741_v55 }
0x1c13   :  { %2742 = vrcp.f32 %v1541_v58 }
0x1c20   :  { %v2743_v0 = vpop.eup %2742 }
0x1c21   :  { %v1555_v13 = vsub.f32 1.0, %v2743_v0  ;;  %v1561_v15 = vmul.f32 %v2743_v0, %v3364_v33 }
0x1c71   :  { %v1546_v37 = vpop.permute.xlu1 %1545 }
0x1c72   :  { %v1548_v59 = vmul.f32 %v2743_v0, %v1546_v37 }
0x1c74   :  { %1550 = vrot.lane.b32.xlu0 %v1548_v59, %s2827_s17 }
0x1ce6   :  { %v1551_v26 = vpop.permute.xlu0 %1550 }
0x1ce7   :  { %v1553_v11 = vadd.f32 %v1551_v26, %v124_v53 }
0x1ce9   :  { %2744 = vtanh.f32 %v1553_v11 }
0x1cf6   :  { %v2745_v12 = vpop.eup %2744 }
0x1cf7   :  { %1557 = vrot.lane.b32.xlu1 %v2745_v12, %s2828_s5 }
0x1cfb   :  { %1638 = vrot.lane.b32.xlu1 %v1533_v46, %s2829_s26 }
0x1d69   :  { %v1558_v14 = vpop.permute.xlu1 %1557 }
0x1d6a   :  { %v1560_v16 = vmul.f32 %v1558_v14, %v1555_v13 }
0x1d6c   :  { %v3511_v17 = vadd.f32 %v1561_v15, %v1560_v16 }
0x1d6e   :  { %1564 = vrot.lane.b32.xlu0 %v3511_v17, %s2828_s5 }
0x1d72   :  { %1659 = vrot.lane.b32.xlu0 %v1535_v52, %s2828_s5 }
0x1d76   :  { %1649 = vrot.lane.b32.xlu0 %v1535_v52, %s2829_s26 }
0x1d7a   :  { %94 = vperm.xlu0 %2643, %v55_v22  }
0x1de0   :  { %v1565_v24 = vpop.permute.xlu0 %1564 }
0x1de1   :  { %2582 = vmatmul.mubr.msk.f32.vlgmr.msra.gmra.mxu1 %vm269_vm1, %v1565_v24 }
0x1de2   :  { %1699 = vmatpush1.msra.mxu1 %v3381_v60  ;;  %1746 = vmatprep.mubr.f32.mxu1 %v2825_v4  ;;  %v3542_v60 = vld [vmem:[%s3689_s7] ss:$0 sm:$0xff] }
0x1de3   :  { %1700 = vmatprep.subr.mxu1 %v3388_v61 }
0x1de4   :  { %1701 = vmatpush1.msra.mxu1 %v3394_v62  ;;  %v1639_v62 = vpop.permute.xlu1 %1638 }
0x1de5   :  { %1702 = vmatprep.subr.mxu1 %v3400_v63 }
0x1de6   :  { %1703 = vmatpush1.msra.mxu1 %v3406_v6 }
0x1de7   :  { %1704 = vmatprep.subr.mxu1 %v3412_v19 }
0x1de8   :  { %1705 = vmatpush1.msra.mxu1 %v3418_v20 }
0x1de9   :  { %1706 = vmatprep.subr.mxu1 %v3424_v21 }
0x1dea   :  { %1707 = vmatpush1.msra.mxu1 %v3430_v1 }
0x1deb   :  { %1708 = vmatprep.subr.mxu1 %v3436_v2  ;;  %v1660_v2 = vpop.permute.xlu0 %1659 }
0x1dec   :  { %1709 = vmatpush1.msra.mxu1 %v3442_v3 }
0x1ded   :  { %1710 = vmatprep.subr.mxu1 %v3448_v5 }
0x1dee   :  { %1711 = vmatpush1.msra.mxu1 %v3454_v7 }
0x1def   :  { %1712 = vmatprep.subr.mxu1 %v3460_v8 }
0x1df0   :  { %1713 = vmatpush1.msra.mxu1 %v3466_v9  ;;  %v1650_v9 = vpop.permute.xlu0 %1649 }
0x1df1   :  { %2606 = vmatprep.subr.mxu1 %v2825_v4 }
0x1df5   :  { %v95_v10 = vpop.permute.xlu0 %94 }
0x1df6   :  { %v110_v39 = vmul.f32 %v3356_v42, %v95_v10 }
0x1ea1   :  { %v1634_v33 = vpop.f32.mrf.mxu1 }
0x1ea2   :  { %v1635_v61 = vadd.f32 %v3542_v60, %v1634_v33  ;;  %v1896_v33 = vld [vmem:[%s3690_s8 + $0x18] sm:$0xff] }
0x1ea3   :  { %v2583_v63 = vpop.f32.mrf.mxu1 }
0x1ea4   :  { %v1641_v6 = vadd.f32 %v1639_v62, %v1635_v61  ;;  %v1652_v57 = vadd.f32 %v1650_v9, %v1635_v61  ;;  %v1893_v62 = vld [vmem:[%s3690_s8] sm:$0xff] }
0x1ea6   :  { %v2441_v19 = vmul.f32 -1.442695, %v1641_v6  ;;  %v2442_v25 = vmul.f32 -1.442695, %v1652_v57 }
0x1ea8   :  { %2746 = vpow2.f32 %v2441_v19 }
0x1eb5   :  { %v2747_v20 = vpop.eup %2746 }
0x1eb6   :  { %v1645_v21 = vadd.f32 1.0, %v2747_v20 }
0x1eb8   :  { %2748 = vrcp.f32 %v1645_v21 }
0x1ec5   :  { %v2749_v1 = vpop.eup %2748 }
0x1ec6   :  { %v1662_v3 = vmul.f32 %v2749_v1, %v1660_v2 }
0x1ec8   :  { %1664 = vrot.lane.b32.xlu1 %v1662_v3, %s2827_s17 }
0x1f3a   :  { %v1665_v5 = vpop.permute.xlu1 %1664 }
0x1f3b   :  { %v1667_v7 = vadd.f32 %v1665_v5, %v1635_v61  ;;  %v1894_v61 = vld [vmem:[%s3690_s8 + $0x8] sm:$0xff] }
0x1f3d   :  { %2750 = vtanh.f32 %v1667_v7 }
0x1f3e   :  { %2752 = vpow2.f32 %v2442_v25  ;;  %v2448_v25 = vld [vmem:[%s3691_s9] ss:$0 sm:$0xff] }
0x1f4a   :  { %v2751_v8 = vpop.eup %2750 }
0x1f4b   :  { %1671 = vrot.lane.b32.xlu1 %v2751_v8, %s2828_s5  ;;  %v2753_v27 = vpop.eup %2752 }
0x1f4c   :  { %v1656_v56 = vadd.f32 1.0, %v2753_v27 }
0x1f4e   :  { %2754 = vrcp.f32 %v1656_v56 }
0x1f5b   :  { %v2755_v28 = vpop.eup %2754 }
0x1f5c   :  { %v1669_v30 = vsub.f32 1.0, %v2755_v28  ;;  %v1675_v34 = vmul.f32 %v2755_v28, %v3474_v44  ;;  %v125_v44 = vadd.f32 %v3504_v49, %v110_v39 }
0x1fbd   :  { %v1672_v31 = vpop.permute.xlu1 %1671 }
0x1fbe   :  { %v1674_v35 = vmul.f32 %v1672_v31, %v1669_v30 }
0x1fc0   :  { %v3548_v41 = vadd.f32 %v1675_v34, %v1674_v35  ;;  %v3601_v35 = vld [vmem:[%s3683_s1] sm:$0xff]  ;;  %s2832_s1 = smov 126  }
0x1fc2   :  { %v1678_v36 = vsel %vm269_vm1, %v1565_v24, %v3548_v41 }
0x1fc3   :  { %2443 = vmatmul.mubr.msk.f32.vlgmr.msra.gmra.mxu1 %vm159_vm2, %v1678_v36  ;;  %vm2199_vm2 = vcmask 39936  }
0x1fc4   :  { %2608 = vmatprep.mubr.msk.f32.mxu1 %vm2830_vm0, %v2825_v4 }
0x2083   :  { %v1748_v38 = vpop.f32.mrf.mxu1 }
0x2084   :  { %v1749_v43 = vadd.f32 %v1748_v38, %v3017_v23 }
0x2085   :  { %v1750_v0 = vpop.f32.mrf.mxu1 }
0x2086   :  { %1761 = vrot.lane.b32.xlu1 %v1749_v43, %s2827_s17  ;;  %v1753_v32 = vadd.f32 %v1749_v43, %v125_v44  ;;  %v1751_v37 = vadd.f32 %v1750_v0, %v3076_v50 }
0x2088   :  { %v2444_v51 = vmul.f32 -1.442695, %v1753_v32 }
0x208a   :  { %2756 = vpow2.f32 %v2444_v51 }
0x2097   :  { %v2757_v40 = vpop.eup %2756 }
0x2098   :  { %v1757_v45 = vadd.f32 1.0, %v2757_v40 }
0x209a   :  { %2758 = vrcp.f32 %v1757_v45 }
0x20a7   :  { %v2759_v46 = vpop.eup %2758 }
0x20a8   :  { %v1771_v42 = vsub.f32 1.0, %v2759_v46  ;;  %v1777_v54 = vmul.f32 %v2759_v46, %v3511_v17 }
0x20f8   :  { %v1762_v47 = vpop.permute.xlu1 %1761 }
0x20f9   :  { %v1764_v48 = vmul.f32 %v2759_v46, %v1762_v47 }
0x20fb   :  { %1766 = vrot.lane.b32.xlu0 %v1764_v48, %s2827_s17 }
0x216d   :  { %v1767_v53 = vpop.permute.xlu0 %1766 }
0x216e   :  { %v1769_v23 = vadd.f32 %v1767_v53, %v125_v44 }
0x2170   :  { %2760 = vtanh.f32 %v1769_v23 }
0x217d   :  { %v2761_v29 = vpop.eup %2760 }
0x217e   :  { %1773 = vrot.lane.b32.xlu1 %v2761_v29, %s2828_s5 }
0x2182   :  { %1854 = vrot.lane.b32.xlu1 %v1749_v43, %s2829_s26 }
0x21f0   :  { %v1774_v49 = vpop.permute.xlu1 %1773 }
0x21f1   :  { %v1776_v55 = vmul.f32 %v1774_v49, %v1771_v42 }
0x21f3   :  { %v1778_v58 = vadd.f32 %v1777_v54, %v1776_v55 }
0x21f4   :  { %v1855_v12 = vpop.permute.xlu1 %1854 }
0x21f5   :  { %1780 = vrot.lane.b32.xlu0 %v1778_v58, %s2828_s5 }
0x21f9   :  { %1875 = vrot.lane.b32.xlu0 %v1751_v37, %s2828_s5 }
0x21fd   :  { %1865 = vrot.lane.b32.xlu0 %v1751_v37, %s2829_s26 }
0x2267   :  { %v1781_v59 = vpop.permute.xlu0 %1780 }
0x2268   :  { %2593 = vmatmul.mubr.msk.f32.vlgmr.msra.gmra.mxu0 %vm269_vm1, %v1781_v59 }
0x2269   :  { %2603 = vmatprep.mubr.msk.f32.mxu0 %vm2830_vm0, %v2825_v4  ;;  %2596 = vmatpush3.msra.mxu0 %v1896_v33 }
0x226a   :  { %2597 = vmatprep.subr.mxu0 %v2825_v4 }
0x226b   :  { %v1876_v18 = vpop.permute.xlu0 %1875 }
0x226f   :  { %v1866_v6 = vpop.permute.xlu0 %1865 }
0x2328   :  { %v1850_v26 = vpop.f32.mrf.mxu0 }
0x2329   :  { %v1851_v11 = vadd.f32 %v3542_v60, %v1850_v26  ;;  %v1895_v60 = vld [vmem:[%s3690_s8 + $0x10] sm:$0xff] }
0x232a   :  { %v2594_v13 = vpop.f32.mrf.mxu0  ;;  %2598 = vmatpush3.msra.mxu0 %v1895_v60 }
0x232b   :  { %v1857_v14 = vadd.f32 %v1855_v12, %v1851_v11  ;;  %2599 = vmatprep.subr.mxu0 %v2825_v4  ;;  %v1868_v19 = vadd.f32 %v1866_v6, %v1851_v11 }
0x232c   :  { %2600 = vmatpush3.msra.mxu0 %v1894_v61 }
0x232d   :  { %v2446_v15 = vmul.f32 -1.442695, %v1857_v14  ;;  %2601 = vmatprep.subr.mxu0 %v2825_v4  ;;  %v2447_v20 = vmul.f32 -1.442695, %v1868_v19 }
0x232e   :  { %2602 = vmatpush3.msra.mxu0 %v1893_v62 }
0x232f   :  { %2762 = vpow2.f32 %v2446_v15 }
0x233c   :  { %v2763_v16 = vpop.eup %2762 }
0x233d   :  { %v1861_v50 = vadd.f32 1.0, %v2763_v16 }
0x233f   :  { %2764 = vrcp.f32 %v1861_v50 }
0x234c   :  { %v2765_v17 = vpop.eup %2764 }
0x234d   :  { %v1878_v52 = vmul.f32 %v2765_v17, %v1876_v18 }
0x234f   :  { %1880 = vrot.lane.b32.xlu1 %v1878_v52, %s2827_s17 }
0x23c1   :  { %v1881_v22 = vpop.permute.xlu1 %1880 }
0x23c2   :  { %v1883_v24 = vadd.f32 %v1881_v22, %v1851_v11 }
0x23c4   :  { %2766 = vtanh.f32 %v1883_v24 }
0x23c5   :  { %2768 = vpow2.f32 %v2447_v20 }
0x23d1   :  { %v2767_v63 = vpop.eup %2766 }
0x23d2   :  { %1887 = vrot.lane.b32.xlu1 %v2767_v63, %s2828_s5  ;;  %v2769_v21 = vpop.eup %2768 }
0x23d3   :  { %v1872_v1 = vadd.f32 1.0, %v2769_v21 }
0x23d5   :  { %2770 = vrcp.f32 %v1872_v1 }
0x23e2   :  { %v2771_v2 = vpop.eup %2770 }
0x23e3   :  { %v1885_v3 = vsub.f32 1.0, %v2771_v2  ;;  %v1891_v7 = vmul.f32 %v2771_v2, %v3548_v41 }
0x2444   :  { %v1888_v5 = vpop.permute.xlu1 %1887 }
0x2445   :  { %v1890_v8 = vmul.f32 %v1888_v5, %v1885_v3 }
0x2447   :  { %v1892_v9 = vadd.f32 %v1891_v7, %v1890_v8 }
0x2449   :  { %1905 = vrot.lane.b32.xlu0 %v1892_v9, %s2828_s5 }
0x24bb   :  { %v1906_v57 = vpop.permute.xlu0 %1905 }
0x24bc   :  { %2604 = vmatmul.mubr.msk.f32.vlgmr.msra.gmra.mxu0 %vm269_vm1, %v1906_v57 }
0x257c   :  { %v1975_v27 = vpop.f32.mrf.mxu0 }
0x257d   :  { %v3594_v56 = vadd.f32 %v2448_v25, %v1975_v27 }
0x257e   :  { %v2605_v28 = vpop.f32.mrf.mxu0 }
0x257f   :  { %v1981_v30 = vmul.f32 -0.5, %v3594_v56  ;;  %v1980_v41 = vsub.f32 %v3601_v35, %v3594_v56  ;;  %v1989_v45 = vmul.f32 %v3594_v56, %v3594_v56 }
0x2581   :  { %v1982_v31 = vmul.f32 1.442695, %v1981_v30 }
0x2583   :  { %2772 = vpow2.f32 %v1982_v31 }
0x2590   :  { %v2773_v34 = vpop.eup %2772 }
0x2591   :  { %1985 = vrot.lane.b32.xlu1 %v2773_v34, %s2831_s19 }
0x2603   :  { %v1986_v36 = vpop.permute.xlu1 %1985 }
0x2604   :  { %v3605_v38 = vmul.f32 %v1986_v36, %v1980_v41  ;;  %v2108_v41 = vrot.slane %v3594_v56, 4 }
0x2606   :  { %2000 = vperm.xlu0 %2643, %v3605_v38   ;;  %v2039_v43 = vsel %vm2038_vm3, %v3605_v38, 0.0  ;;  %v3611_v10 = vmul.f32 %v3605_v38, %v3605_v38  ;;  %v2136_v51 = vrot.slane %v3605_v38, 4  ;;  %v2110_v36 = vsel %vm2004_vm4, %v2108_v41, 0.0 }
0x2607   :  { %2040 = vadd.xlane.f32.xlu1 %v2039_v43  ;;  %v2012_v43 = vsel %vm2004_vm4, %v3594_v56, 0.0 }
0x2608   :  { %v2149_v39 = vrot.slane %v3611_v10, 4  ;;  %v2050_v32 = vsel %vm2038_vm3, %v3611_v10, 0.0  ;;  %v2138_v40 = vsel %vm2038_vm3, %v2136_v51, 0.0 }
0x260a   :  { %v2151_v44 = vsel %vm2038_vm3, %v2149_v39, 0.0  ;;  %v2111_v39 = vrot.slane %v2110_v36, 4 }
0x260b   :  { %2152 = vadd.xlane.f32.xlu1 %v2151_v44  ;;  %v2013_v44 = vrot.slane %v2012_v43, 4 }
0x2625   :  { %2051 = vadd.xlane.f32.xlu0 %v2050_v32 }
0x2629   :  { %2139 = vadd.xlane.f32.xlu0 %v2138_v40  ;;  %v2112_v40 = vadd.f32 %v2111_v39, %v2110_v36 }
0x263f   :  { %1991 = vrot.lane.b32.xlu0 %v1989_v45, %s2832_s1  ;;  %v2014_v45 = vadd.f32 %v2013_v44, %v2012_v43 }
0x2681   :  { %v2001_v46 = vpop.permute.xlu0 %2000 }
0x2682   :  { %v2003_v47 = vmul.f32 %v2001_v46, %v3594_v56 }
0x2684   :  { %v2005_v48 = vsel %vm2004_vm4, %v2003_v47, 0.0  ;;  %v2098_v53 = vrot.slane %v2003_v47, 4 }
0x2685   :  { %v2006_v23 = vrot.slane %v2005_v48, 4 }
0x2686   :  { %v2100_v29 = vsel %vm2004_vm4, %v2098_v53, 0.0  ;;  %v2015_v53 = vrot.slane %v2014_v45, 2 }
0x2687   :  { %v2007_v42 = vadd.f32 %v2006_v23, %v2005_v48  ;;  %v2101_v49 = vrot.slane %v2100_v29, 4  ;;  %v2113_v48 = vrot.slane %v2112_v40, 2 }
0x2689   :  { %v2008_v54 = vrot.slane %v2007_v42, 2  ;;  %v2102_v55 = vadd.f32 %v2101_v49, %v2100_v29  ;;  %v2114_v23 = vadd.f32 %v2113_v48, %v2112_v40  ;;  %v2016_v29 = vadd.f32 %v2015_v53, %v2014_v45 }
0x268b   :  { %v2009_v58 = vadd.f32 %v2008_v54, %v2007_v42  ;;  %v2103_v0 = vrot.slane %v2102_v55, 2  ;;  %v2115_v42 = vrot.slane %v2114_v23, 1  ;;  %v2017_v49 = vrot.slane %v2016_v29, 1 }
0x268d   :  { %v2010_v37 = vrot.slane %v2009_v58, 1  ;;  %v2104_v59 = vadd.f32 %v2103_v0, %v2102_v55  ;;  %v2116_v54 = vadd.f32 %v2115_v42, %v2114_v23  ;;  %v2018_v55 = vadd.f32 %v2017_v49, %v2016_v29 }
0x268f   :  { %v2011_v26 = vadd.f32 %v2010_v37, %v2009_v58  ;;  %v2105_v11 = vrot.slane %v2104_v59, 1  ;;  %v2127_v58 = vmul.f32 %v2116_v54, %v3594_v56  ;;  %v2029_v0 = vmul.f32 %v2018_v55, %v3594_v56  ;;  %v2281_v54 = vld [vmem:[%s3694_s12 + $0x18] sm:$0xff] }
0x2690   :  { %v2041_v12 = vpop.xlane.xlu1 %2040 }
0x2691   :  { %v2042_v13 = vrot.slane %v2041_v12, 4  ;;  %v2019_v14 = vmul.f32 %v2011_v26, %v3594_v56  ;;  %v2106_v15 = vadd.f32 %v2105_v11, %v2104_v59 }
0x2693   :  { %v2043_v16 = vadd.f32 %v2042_v13, %v2041_v12  ;;  %2021 = vrot.lane.b32.xlu1 %v2019_v14, %s2832_s1  ;;  %v2117_v17 = vmul.f32 %v2106_v15, %v3594_v56 }
0x2694   :  { %v2153_v24 = vpop.xlane.xlu1 %2152 }
0x2695   :  { %v2044_v50 = vrot.slane %v2043_v16, 2  ;;  %v2154_v33 = vrot.slane %v2153_v24, 4 }
0x2697   :  { %2119 = vrot.lane.b32.xlu1 %v2117_v17, %s2832_s1  ;;  %v2045_v18 = vadd.f32 %v2044_v50, %v2043_v16  ;;  %v2155_v60 = vadd.f32 %v2154_v33, %v2153_v24 }
0x2699   :  { %v2046_v52 = vrot.slane %v2045_v18, 1  ;;  %v2156_v6 = vrot.slane %v2155_v60, 2 }
0x269b   :  { %v2047_v22 = vadd.f32 %v2046_v52, %v2045_v18  ;;  %v2157_v5 = vadd.f32 %v2156_v6, %v2155_v60 }
0x269d   :  { %2622 = vpush %v2047_v22  ;;  %v2158_v28 = vrot.slane %v2157_v5, 1 }
0x269f   :  { %v2159_v34 = vadd.f32 %v2158_v28, %v2157_v5 }
0x26ae   :  { %v2052_v61 = vpop.xlane.xlu0 %2051 }
0x26af   :  { %v2053_v62 = vrot.slane %v2052_v61, 4 }
0x26b1   :  { %v2054_v63 = vadd.f32 %v2053_v62, %v2052_v61 }
0x26b2   :  { %v2140_v19 = vpop.xlane.xlu0 %2139 }
0x26b3   :  { %v2055_v20 = vrot.slane %v2054_v63, 2  ;;  %v2141_v21 = vrot.slane %v2140_v19, 4 }
0x26b5   :  { %v2142_v1 = vadd.f32 %v2141_v21, %v2140_v19  ;;  %v2056_v2 = vadd.f32 %v2055_v20, %v2054_v63 }
0x26b6   :  { %v1992_v3 = vpop.permute.xlu0 %1991 }
0x26b7   :  { %v2143_v7 = vrot.slane %v2142_v1, 2  ;;  %v1995_v8 = vsel %vm1994_vm5, %v1992_v3, 0.0  ;;  %v2057_v9 = vrot.slane %v2056_v2, 1  ;;  %v2094_v27 = vsel %vm2093_vm6, %v1992_v3, 0.0 }
0x26b8   :  { %1996 = vadd.xlane.f32.xlu0 %v1995_v8 }
0x26b9   :  { %v2058_v57 = vadd.f32 %v2057_v9, %v2056_v2  ;;  %v2144_v25 = vadd.f32 %v2143_v7, %v2142_v1 }
0x26bb   :  { %2095 = vadd.xlane.f32.xlu1 %v2094_v27  ;;  %2624 = vpush %v2058_v57  ;;  %v2145_v30 = vrot.slane %v2144_v25, 1  ;;  %v2191_v27 = vld [vmem:[%s3692_s10] sm:$0x1f] }
0x26bc   :  { %2607 = vmatpush3.msk.msra.mxu1 %vm2203_vm7, %v2191_v27 }
0x26bd   :  { %v2146_v31 = vadd.f32 %v2145_v30, %v2144_v25  ;;  %2611 = vmatprep.subr.mxu1 %v2825_v4 }
0x26bf   :  { %2626 = vpush %v2146_v31 }
0x26c0   :  { %2628 = vpush %v2159_v34 }
0x26ce   :  { %s2623_s9 = spop %2622 }
0x26cf   :  { %v2060_v59 = vstv %s2623_s9 }
0x26d0   :  { %v2061_v11 = vsub.f32 %v2060_v59, %v3605_v38 }
0x26d2   :  { %v2063_v13 = vmul.f32 0.33333334, %v2061_v11 }
0x26d4   :  { %v2066_v16 = vmul.f32 3.0, %v2063_v13 }
0x26d6   :  { %v2067_v22 = vmul.f32 %v2066_v16, %v2063_v13  ;;  %v2453_v13 = vld [vmem:[%s3695_s13] ss:$0 sm:$0xff] }
0x26ec   :  { %s2625_s21 = spop %2624 }
0x26ed   :  { %v2064_v15 = vstv %s2625_s21 }
0x26ee   :  { %v2065_v18 = vsub.f32 %v2064_v15, %v3611_v10 }
0x26f0   :  { %s2627_s22 = spop %2626  ;;  %v2068_v33 = vsub.f32 %v2065_v18, %v2067_v22 }
0x26f1   :  { %v2161_v37 = vstv %s2627_s22  ;;  %s2629_s23 = spop %2628 }
0x26f2   :  { %v2162_v26 = vsub.f32 %v2161_v37, %v3605_v38  ;;  %v2164_v50 = vstv %s2629_s23  ;;  %v2070_v62 = vmul.f32 0.5, %v2068_v33  ;;  %v2450_v37 = vld [vmem:[%s3693_s11] ss:$0 sm:$0xff]  ;;  %s2835_s11 = smov [#allocation2]  }
0x26f3   :  { %v2165_v52 = vsub.f32 %v2164_v50, %v3611_v10 }
0x26f4   :  { %v2163_v12 = vmul.f32 0.33333334, %v2162_v26  ;;  %v2071_v20 = vmax.f32 %v2070_v62, 0.0 }
0x26f6   :  { %v2166_v14 = vmul.f32 3.0, %v2163_v12  ;;  %vm2074_vm9 = vcmp.eq.f32.partialorder %v2071_v20, inf  ;;  %vm2076_vm11 = vcmp.eq.f32.partialorder %v2071_v20, 0.0 }
0x26f8   :  { %v2167_v17 = vmul.f32 %v2166_v14, %v2163_v12 }
0x26fa   :  { %v2168_v24 = vsub.f32 %v2165_v52, %v2167_v17 }
0x26fc   :  { %v2169_v61 = vmul.f32 0.5, %v2168_v24 }
0x26fe   :  { %v2170_v19 = vmax.f32 %v2169_v61, 0.0 }
0x2700   :  { %2774 = vrsqrt.f32 %v2170_v19  ;;  %vm2173_vm8 = vcmp.eq.f32.partialorder %v2170_v19, inf  ;;  %v2176_v34 = vand.u32 2147483648, %v2170_v19  ;;  %vm2175_vm10 = vcmp.eq.f32.partialorder %v2170_v19, 0.0 }
0x2701   :  { %2776 = vrsqrt.f32 %v2071_v20 }
0x2705   :  { %v2022_v32 = vpop.permute.xlu1 %2021 }
0x2706   :  { %v2024_v51 = vsel %vm1994_vm5, %v2022_v32, 0.0 }
0x2707   :  { %2025 = vadd.xlane.f32.xlu0 %v2024_v51 }
0x2709   :  { %v2120_v46 = vpop.permute.xlu1 %2119 }
0x270a   :  { %v2122_v47 = vsel %vm2093_vm6, %v2120_v46, 0.0 }
0x270b   :  { %2123 = vadd.xlane.f32.xlu1 %v2122_v47 }
0x270d   :  { %v2775_v5 = vpop.eup %2774 }
0x270e   :  { %v2777_v7 = vpop.eup %2776  ;;  %v2172_v9 = vmul.f32 %v2775_v5, %v2170_v19 }
0x270f   :  { %v2073_v25 = vmul.f32 %v2777_v7, %v2071_v20 }
0x2710   :  { %v2174_v31 = vsel %vm2173_vm8, %v2170_v19, %v2172_v9 }
0x2711   :  { %v2075_v41 = vsel %vm2074_vm9, %v2071_v20, %v2073_v25  ;;  %v2177_v36 = vsel %vm2175_vm10, %v2176_v34, %v2174_v31 }
0x271c   :  { %2129 = vrot.lane.b32.xlu1 %v2127_v58, %s2832_s1  ;;  %v2279_v58 = vld [vmem:[%s3694_s12 + $0x8] sm:$0xff] }
0x271d   :  { %2031 = vrot.lane.b32.xlu0 %v2029_v0, %s2832_s1  ;;  %v2278_v0 = vld [vmem:[%s3694_s12] sm:$0xff] }
0x2741   :  { %v1997_v60 = vpop.xlane.xlu0 %1996 }
0x2742   :  { %v2027_v57 = vmul.f32 %v1997_v60, %v3605_v38 }
0x2744   :  { %v2096_v63 = vpop.xlane.xlu1 %2095 }
0x2745   :  { %v2125_v8 = vmul.f32 %v2096_v63, %v3605_v38  ;;  %v2077_v38 = vand.u32 2147483648, %v2071_v20 }
0x2747   :  { %v2078_v43 = vsel %vm2076_vm11, %v2077_v38, %v2075_v41 }
0x2790   :  { %v2026_v6 = vpop.xlane.xlu0 %2025 }
0x2791   :  { %v2028_v30 = vsub.f32 %v2026_v6, %v2027_v57 }
0x2794   :  { %v2032_v21 = vpop.permute.xlu0 %2031  ;;  %v2124_v1 = vpop.xlane.xlu1 %2123 }
0x2795   :  { %v2034_v2 = vsel %vm1994_vm5, %v2032_v21, 0.0  ;;  %v2126_v28 = vsub.f32 %v2124_v1, %v2125_v8 }
0x2796   :  { %2035 = vadd.xlane.f32.xlu0 %v2034_v2 }
0x2798   :  { %v2130_v3 = vpop.permute.xlu1 %2129 }
0x2799   :  { %v2132_v10 = vsel %vm2093_vm6, %v2130_v3, 0.0 }
0x279a   :  { %2133 = vadd.xlane.f32.xlu1 %v2132_v10 }
0x27ab   :  { %2179 = vrot.lane.b32.xlu1 %v2126_v28, %s2833_s27 }
0x27ac   :  { %2080 = vrot.lane.b32.xlu0 %v2028_v30, %s2833_s27 }
0x27af   :  { %2183 = vrot.lane.b32.xlu1 %v2177_v36, %s2834_s28 }
0x27b0   :  { %2084 = vrot.lane.b32.xlu0 %v2078_v43, %s2834_s28 }
0x281f   :  { %v2036_v39 = vpop.xlane.xlu0 %2035 }
0x2820   :  { %v2037_v46 = vsub.f32 %v2036_v39, %v1997_v60 }
0x2823   :  { %v2081_v44 = vpop.permute.xlu0 %2080  ;;  %v2134_v32 = vpop.xlane.xlu1 %2133 }
0x2824   :  { %v2088_v40 = vsel %vm2087_vm12, %v3594_v56, %v2081_v44  ;;  %v2135_v47 = vsub.f32 %v2134_v32, %v2096_v63 }
0x2825   :  { %v2090_v53 = vsel %vm2089_vm13, %v2088_v40, %v2037_v46 }
0x2827   :  { %v2180_v51 = vpop.permute.xlu1 %2179  ;;  %v2085_v48 = vpop.permute.xlu0 %2084 }
0x2828   :  { %v2186_v45 = vsel %vm2087_vm12, %v3594_v56, %v2180_v51  ;;  %v2092_v42 = vsel %vm2091_vm14, %v2090_v53, %v2085_v48  ;;  %v2280_v56 = vld [vmem:[%s3694_s12 + $0x10] sm:$0xff]  ;;  %s2398_s12 = sshll.u32 %s2835_s11, 4  ;;  %s2399_s12 = int_to_ptr.vmem [resolvable:$true] %s2398_s12 }
0x2829   :  { %v2187_v23 = vsel %vm2089_vm13, %v2186_v45, %v2135_v47  ;;  %s2803_s18 = scalar_lea.vmem %s2399_s12, 16  ;;  %s2807_s8 = scalar_lea.vmem %s2399_s12, 32 }
0x282a   :  { %p2804_p0 = scmp.ne.s32.totalorder %s2399_s12, %s2803_s18  ;;  %p2808_p1 = scmp.lt.s32.totalorder %s2399_s12, %s2399_s12 }
0x282b   :  { %v2184_v29 = vpop.permute.xlu1 %2183  ;;  %p2809_p2 = scmp.lt.s32.totalorder %s2807_s8, %s2803_s18 }
0x282c   :  { %v2188_v49 = vsel %vm2091_vm14, %v2187_v23, %v2184_v29 }
0x282d   :  { %v2190_v55 = vsel %vm2189_vm15, %v2092_v42, %v2188_v49  ;;  %p2810_p3 = por %p2809_p2, %p2808_p1 }
0x282e   :  { %2609 = vmatmul.mubr.msk.f32.vlgmr.msra.gmra.mxu1 %vm2199_vm2, %v2190_v55 }
0x282f   :  { %2612 = vmatpush3.msra.mxu1 %v2281_v54  ;;  %2619 = vmatprep.mubr.msk.f32.mxu1 %vm2830_vm0, %v2825_v4  ;;  %vm2378_vm0 = vcmask 7168   ;;  %p2811_p4 = pnand %p2810_p3, %p2804_p0 }
0x2830   :  { %2613 = vmatprep.subr.mxu1 %v2825_v4 }
0x2831   :  { %2614 = vmatpush3.msra.mxu1 %v2280_v56 }
0x2832   :  { %2615 = vmatprep.subr.mxu1 %v2825_v4 }
0x2833   :  { %2616 = vmatpush3.msra.mxu1 %v2279_v58 }
0x2834   :  { %2617 = vmatprep.subr.mxu1 %v2825_v4 }
0x2835   :  { %2618 = vmatpush3.msra.mxu1 %v2278_v0 }
0x28ee   :  { %v2273_v59 = vpop.f32.mrf.mxu1 }
0x28ef   :  { %v2274_v26 = vadd.f32 %v2450_v37, %v2273_v59 }
0x28f0   :  { %v2610_v11 = vpop.f32.mrf.mxu1 }
0x28f1   :  { %v2277_v12 = vmax.f32 %v2274_v26, 0.0 }
0x28f3   :  { %2620 = vmatmul.mubr.msk.f32.vlgmr.msra.gmra.mxu1 %vm269_vm1, %v2277_v12  ;;  %vm2390_vm1 = vcmask 0  }
0x29b3   :  { %v2358_v14 = vpop.f32.mrf.mxu1 }
0x29b4   :  { %v2359_v15 = vadd.f32 %v2453_v13, %v2358_v14 }
0x29b5   :  { %v2621_v16 = vpop.f32.mrf.mxu1 }
0x29b6   :  { %v2364_v50 = vsub.f32 0.0, %v2359_v15  ;;  %2374 = vrot.lane.b32.xlu1 %v2359_v15, %s2831_s19  ;;  %v2362_v18 = vsub.f32 %v3601_v35, %v2359_v15 }
0x29b8   :  { %v2365_v4 = vmul.f32 1.442695, %v2364_v50  ;;  %v2363_v52 = vmul.f32 %v2362_v18, %v2362_v18 }
0x29ba   :  { %2778 = vpow2.f32 %v2365_v4 }
0x29c7   :  { %v2779_v17 = vpop.eup %2778 }
0x29c8   :  { %2368 = vrot.lane.b32.xlu0 %v2779_v17, %s2831_s19 }
0x2a28   :  { %v2375_v60 = vpop.permute.xlu1 %2374 }
0x2a3a   :  { %v2369_v22 = vpop.permute.xlu0 %2368 }
0x2a3b   :  { %v2371_v24 = vmul.f32 %v2369_v22, %v2363_v52 }
0x2a3d   :  { %v2372_v33 = vmul.f32 0.5, %v2371_v24 }
0x2a3f   :  { %v2377_v61 = vadd.f32 %v2375_v60, %v2372_v33 }
0x2a41   :  { %v2379_v62 = vsel %vm2378_vm0, %v2377_v61, 0.0 }
0x2a42   :  { %2380 = vadd.xlane.f32.xlu0 %v2379_v62 }
0x2acb   :  { %v2381_v63 = vpop.xlane.xlu0 %2380 }
0x2acc   :  { %v2382_v6 = vrot.slane %v2381_v63, 4 }
0x2ace   :  { %v2383_v19 = vadd.f32 %v2382_v6, %v2381_v63 }
0x2ad0   :  { %v2384_v20 = vrot.slane %v2383_v19, 2 }
0x2ad2   :  { %v2385_v21 = vadd.f32 %v2384_v20, %v2383_v19 }
0x2ad4   :  { %v2386_v1 = vrot.slane %v2385_v21, 1 }
0x2ad6   :  { %v2387_v2 = vadd.f32 %v2386_v1, %v2385_v21 }
0x2ad8   :  { %2630 = vpush %v2387_v2 }
0x2b09   :  { %s2631_s13 = spop %2630 }
0x2b0a   :  { %v2389_v35 = vstv %s2631_s13 }
0x2b0b   :  { %2391 = vst.msk [vmem:[#allocation2] sm:$0x1] %vm2390_vm1, %v2389_v35 }
0x2b0c   :  { %2814 = shalt.err (!%p2811_p4)
}
0x2b0d   :  { %2401 = dma.vmem_to_hbm [thread:$0]  %s2399_s12, 16, %s3696_s14, [#allocation3]  }
0x2b0e   :  { %2823 = dma.done.wait [#allocation3], 16  }
0x2b0f   :  { %2824 = vsyncadd [#allocation3], 4294967280 }
0x2b10   :  { %2405 = vsyncpa [#allocation3], 1 }

</bundles_post_ra>
